<compile_context>
chip_gen: v7x
topology: tpu7x:2x2x1
jax: 0.10.0
libtpu: 0.0.40
codegen_flags: <defaults>
</compile_context>

<pallas_src>
import math
from functools import partial

import jax
import jax.numpy as jnp
from jax.experimental import pallas as pl
from jax.experimental.pallas import tpu as pltpu

# ---------------- config (scaled-down synthetic BERT) ----------------
BATCH = 2
SEQ = 8
HIDDEN = 32
N_HEADS = 4
HEAD_DIM = HIDDEN // N_HEADS
FFN = 64
VOCAB = 100
MAX_POS = 16
N_LAYERS = 2
LN_EPS = 1e-12
POOL = False          # Text2Tensor default: pool=False -> CLS token embd[:, 0, :]


# ---------------- small math helpers (usable inside and outside kernels) ----------------
def _layer_norm(x, g, b, eps=LN_EPS):
    mu = jnp.mean(x, axis=-1, keepdims=True)
    var = jnp.mean(jnp.square(x - mu), axis=-1, keepdims=True)
    return (x - mu) * jax.lax.rsqrt(var + eps) * g + b


def _gelu(x):
    # tanh-approx GELU (transcendentals go to the EUP)
    return 0.5 * x * (1.0 + jnp.tanh(0.7978845608028654 * (x + 0.044715 * x * x * x)))


# ---------------- per-(batch-row, layer) Pallas kernel ----------------
def bert_layer_kernel(word_ref, pos_ref, embln_ref,
                      wqkv_ref, wo_ref, w1_ref, b1_ref, w2_ref, lvec_ref,
                      o_ref, x_ref, *, n_heads, head_dim, pool):
    l = pl.program_id(1)
    n_layers = pl.num_programs(1)
    S, H = x_ref.shape
    nh, hd = n_heads, head_dim

    # ---- fused embedding sum + LayerNorm, only on the first layer step of this row ----
    @pl.when(l == 0)
    def _():
        e = embln_ref[...]                                   # [2, H]: ln_g, ln_b
        x0 = word_ref[...] + pos_ref[...]                    # type-emb folded into pos in wrapper
        x_ref[...] = _layer_norm(x0, e[0:1], e[1:2])

    x2 = x_ref[...]                                          # [S, H] f32, resident across layers

    lv = lvec_ref[...]                                       # [9, H] f32 packed vectors
    bq, bk, bv = lv[0:1], lv[1:2], lv[2:3]
    bo, ln1g, ln1b = lv[3:4], lv[4:5], lv[5:6]
    b2, ln2g, ln2b = lv[6:7], lv[7:8], lv[8:9]

    # ---- Q/K/V projections: three lane-aligned [H,H] bf16 slabs, f32 accumulation.
    #      1/sqrt(hd) is already baked into wq/bq at pack time.
    xb = x2.astype(jnp.bfloat16)
    q = jnp.dot(xb, wqkv_ref[0], preferred_element_type=jnp.float32) + bq    # [S, H]
    k = jnp.dot(xb, wqkv_ref[1], preferred_element_type=jnp.float32) + bk
    v = jnp.dot(xb, wqkv_ref[2], preferred_element_type=jnp.float32) + bv

    # ---- true per-head layout (no mask replication, no wasted MXU lanes) ----
    # 2-D transpose then split only the leading dim: [S,H] -> [H,S] -> [nh, hd, S]
    kT = k.T.reshape(nh, hd, S)                              # K pre-transposed per head
    vT = v.T.reshape(nh, hd, S)
    qh = jnp.swapaxes(q.T.reshape(nh, hd, S), 1, 2)          # [nh, S, hd]

    # scores: plain batched A @ B (no implicit operand transpose)
    s = jnp.einsum('hqd,hdk->hqk', qh, kT,
                   preferred_element_type=jnp.float32)        # [nh, S, S]
    s = s - jnp.max(s, axis=-1, keepdims=True)                # per-head max
    p = jnp.exp(s)
    denom = jnp.sum(p, axis=-1, keepdims=True)                # XLU reduce -- no denom matmul
    p = p / denom                                             # exact normalization
    # PV: contract-both-minors form -> result lands directly as [nh, hd, S]
    ctxT = jnp.einsum('hek,hqk->heq', vT, p,
                      preferred_element_type=jnp.float32)      # [nh, hd, S]
    ctx = ctxT.reshape(H, S).T                                 # merge heads -> [S, H]

    attn = jnp.dot(ctx.astype(jnp.bfloat16), wo_ref[...],
                   preferred_element_type=jnp.float32) + bo
    h1 = _layer_norm(x2 + attn, ln1g, ln1b)

    ff = _gelu(jnp.dot(h1.astype(jnp.bfloat16), w1_ref[...],
                       preferred_element_type=jnp.float32) + b1_ref[...])
    ff = jnp.dot(ff.astype(jnp.bfloat16), w2_ref[...],
                 preferred_element_type=jnp.float32) + b2
    xn = _layer_norm(h1 + ff, ln2g, ln2b)
    x_ref[...] = xn

    # ---- Text2Tensor head (CLS / mean-pool), only at the last layer ----
    @pl.when(l == n_layers - 1)
    def _():
        if pool:
            o_ref[...] = jnp.mean(xn, axis=0, keepdims=True).astype(o_ref.dtype)   # [1, H]
        else:
            o_ref[...] = xn[0:1, :].astype(o_ref.dtype)                            # CLS row


# ---------------- wrapper: pack weights + one pallas_call over grid (B, L) ----------------
def text2tensor_forward(ids, params, pool=POOL):
    B, S = ids.shape
    H, L = HIDDEN, N_LAYERS
    layers = params['layers']
    scale = 1.0 / math.sqrt(HEAD_DIM)

    # data-dependent embedding gather stays in plain JAX (glue); the add + LN are fused in-kernel
    word = jnp.take(params['word_emb'], ids, axis=0)                         # [B, S, H]
    pos = params['pos_emb'][:S] + params['type_emb'][0][None, :]             # [S, H] (type folded)
    embln = jnp.stack([params['emb_ln_g'][0], params['emb_ln_b'][0]], axis=0)  # [2, H]

    # per-layer weight slabs: bf16 matmul weights, f32 vectors; Q/K/V stacked on a
    # leading axis so splits are tile-aligned; attention scale baked into wq/bq.
    wqkv = jnp.stack([jnp.stack([p['wq'] * scale, p['wk'], p['wv']], axis=0)
                      for p in layers]).astype(jnp.bfloat16)                 # [L, 3, H, H]
    wo = jnp.stack([p['wo'] for p in layers]).astype(jnp.bfloat16)           # [L, H, H]
    w1 = jnp.stack([p['w1'] for p in layers]).astype(jnp.bfloat16)           # [L, H, FFN]
    w2 = jnp.stack([p['w2'] for p in layers]).astype(jnp.bfloat16)           # [L, FFN, H]
    b1 = jnp.stack([p['b1'] for p in layers])                                # [L, 1, FFN] f32
    lvec = jnp.stack([jnp.concatenate([p['bq'] * scale, p['bk'], p['bv'],
                                       p['bo'], p['ln1_g'], p['ln1_b'],
                                       p['b2'], p['ln2_g'], p['ln2_b']], axis=0)
                      for p in layers])                                      # [L, 9, H] f32

    flops = B * L * (8 * S * H * H                                  # qkv + wo projections
                     + 4 * N_HEADS * S * S * HEAD_DIM               # scores + PV
                     + 4 * S * H * FFN)                             # FFN
    transc = B * L * (N_HEADS * S * S + S * FFN + 2 * S) + B * S
    bytes_acc = (word.size * 4 + pos.size * 4 + embln.size * 4
                 + wqkv.size * 2 + wo.size * 2 + w1.size * 2 + w2.size * 2
                 + b1.size * 4 + lvec.size * 4 + B * H * 4)

    kernel = partial(bert_layer_kernel, n_heads=N_HEADS, head_dim=HEAD_DIM, pool=pool)
    out = pl.pallas_call(
        kernel,
        out_shape=jax.ShapeDtypeStruct((B, 1, H), jnp.float32),
        grid_spec=pltpu.PrefetchScalarGridSpec(
            num_scalar_prefetch=0,
            grid=(B, L),                                # batch rows parallel, layers sequential
            in_specs=[
                pl.BlockSpec((None, S, H), lambda b, l: (b, 0, 0)),        # word embeddings
                pl.BlockSpec((S, H), lambda b, l: (0, 0)),                 # pos + type emb
                pl.BlockSpec((2, H), lambda b, l: (0, 0)),                 # embedding LN params
                pl.BlockSpec((None, 3, H, H), lambda b, l: (l, 0, 0, 0)),  # wq/wk/wv (bf16)
                pl.BlockSpec((None, H, H), lambda b, l: (l, 0, 0)),        # wo (bf16)
                pl.BlockSpec((None, H, FFN), lambda b, l: (l, 0, 0)),      # w1 (bf16)
                pl.BlockSpec((None, 1, FFN), lambda b, l: (l, 0, 0)),      # b1 (f32)
                pl.BlockSpec((None, FFN, H), lambda b, l: (l, 0, 0)),      # w2 (bf16)
                pl.BlockSpec((None, 9, H), lambda b, l: (l, 0, 0)),        # packed bias/LN vectors
            ],
            out_specs=pl.BlockSpec((None, 1, H), lambda b, l: (b, 0, 0)),
            scratch_shapes=[pltpu.VMEM((S, H), jnp.float32)],              # resident residual stream
        ),
        compiler_params=pltpu.CompilerParams(
            dimension_semantics=("parallel", "arbitrary"),
            vmem_limit_bytes=64 * 1024 * 1024,
        ),
        cost_estimate=pl.CostEstimate(flops=flops, transcendentals=transc,
                                      bytes_accessed=bytes_acc),
    )(word, pos, embln, wqkv, wo, w1, b1, w2, lvec)
    return out.reshape(B, H)


# ---------------- parameters (deterministic synthetic init) ----------------
def init_params(key):
    keys = iter(jax.random.split(key, 64))

    def dense(shape):
        return 0.02 * jax.random.normal(next(keys), shape, jnp.float32)

    params = dict(
        word_emb=dense((VOCAB, HIDDEN)),
        pos_emb=dense((MAX_POS, HIDDEN)),
        type_emb=dense((2, HIDDEN)),
        emb_ln_g=jnp.ones((1, HIDDEN), jnp.float32),
        emb_ln_b=jnp.zeros((1, HIDDEN), jnp.float32),
        layers=[],
    )
    for _ in range(N_LAYERS):
        layer = dict(
            wq=dense((HIDDEN, HIDDEN)), bq=jnp.zeros((1, HIDDEN), jnp.float32),
            wk=dense((HIDDEN, HIDDEN)), bk=jnp.zeros((1, HIDDEN), jnp.float32),
            wv=dense((HIDDEN, HIDDEN)), bv=jnp.zeros((1, HIDDEN), jnp.float32),
            wo=dense((HIDDEN, HIDDEN)), bo=jnp.zeros((1, HIDDEN), jnp.float32),
            ln1_g=jnp.ones((1, HIDDEN), jnp.float32), ln1_b=jnp.zeros((1, HIDDEN), jnp.float32),
            w1=dense((HIDDEN, FFN)), b1=jnp.zeros((1, FFN), jnp.float32),
            w2=dense((FFN, HIDDEN)), b2=jnp.zeros((1, HIDDEN), jnp.float32),
            ln2_g=jnp.ones((1, HIDDEN), jnp.float32), ln2_b=jnp.zeros((1, HIDDEN), jnp.float32),
        )
        params['layers'].append(layer)
    return params


# ---------------- pure-JAX f32 reference for verification ----------------
def reference_forward(ids, params, pool=POOL):
    B, S = ids.shape
    x = (jnp.take(params['word_emb'], ids, axis=0)
         + params['pos_emb'][:S][None, :, :]
         + params['type_emb'][0][None, None, :])
    x = _layer_norm(x, params['emb_ln_g'], params['emb_ln_b'])
    scale = 1.0 / math.sqrt(HEAD_DIM)
    for p in params['layers']:
        q = x @ p['wq'] + p['bq']
        k = x @ p['wk'] + p['bk']
        v = x @ p['wv'] + p['bv']
        split = lambda t: t.reshape(B, S, N_HEADS, HEAD_DIM).transpose(0, 2, 1, 3)
        qh, kh, vh = split(q), split(k), split(v)
        s = jnp.einsum('bhqd,bhkd->bhqk', qh, kh) * scale
        a = jax.nn.softmax(s, axis=-1)
        ctx = jnp.einsum('bhqk,bhkd->bhqd', a, vh).transpose(0, 2, 1, 3).reshape(B, S, HIDDEN)
        attn = ctx @ p['wo'] + p['bo']
        h1 = _layer_norm(x + attn, p['ln1_g'], p['ln1_b'])
        ff = _gelu(h1 @ p['w1'] + p['b1']) @ p['w2'] + p['b2']
        x = _layer_norm(h1 + ff, p['ln2_g'], p['ln2_b'])
    return jnp.mean(x, axis=1) if pool else x[:, 0, :]


if __name__ == "__main__":
    key = jax.random.PRNGKey(0)
    pkey, ikey = jax.random.split(key)
    params = init_params(pkey)
    ids = jax.random.randint(ikey, (BATCH, SEQ), 0, VOCAB, dtype=jnp.int32)

    for pool in (False, True):   # default Text2Tensor uses pool=False (CLS)
        out = jax.block_until_ready(text2tensor_forward(ids, params, pool=pool))
        assert out.shape == (BATCH, HIDDEN), out.shape
        ref = reference_forward(ids, params, pool=pool)
        # tolerance covers bf16 weight quantization vs the f32 reference
        assert bool(jnp.allclose(out, ref, rtol=1e-2, atol=1e-2)), (pool, out, ref)

    print("KERNEL_OK")
</pallas_src>

<mosaic_0001>
module attributes {stable_mosaic.version = 11 : i64} {
  func.func @bert_layer_kernel(%arg0: i32, %arg1: i32, %arg2: memref<1x8x32xf32, #tpu.memory_space<vmem>>, %arg3: memref<8x32xf32, #tpu.memory_space<vmem>>, %arg4: memref<2x32xf32, #tpu.memory_space<vmem>>, %arg5: memref<1x3x32x32xbf16, #tpu.memory_space<vmem>>, %arg6: memref<1x32x32xbf16, #tpu.memory_space<vmem>>, %arg7: memref<1x32x64xbf16, #tpu.memory_space<vmem>>, %arg8: memref<1x1x64xf32, #tpu.memory_space<vmem>>, %arg9: memref<1x64x32xbf16, #tpu.memory_space<vmem>>, %arg10: memref<1x9x32xf32, #tpu.memory_space<vmem>>, %arg11: memref<1x1x32xf32, #tpu.memory_space<vmem>>, %arg12: memref<8x32xf32, #tpu.memory_space<vmem>>) attributes {dimension_semantics = [#tpu.dimension_semantics<parallel>, #tpu.dimension_semantics<arbitrary>], iteration_bounds = array<i64: 2, 2>, scalar_prefetch = 0 : i64, scratch_operands = 1 : i64, tpu.core_type = #tpu.core_type<tc>, window_params = [{transform_indices = @transform_0, window_bounds = array<i64: 1, 8, 32>}, {pipeline_mode = #tpu.pipeline_mode<synchronous>, transform_indices = @transform_1, window_bounds = array<i64: 8, 32>}, {pipeline_mode = #tpu.pipeline_mode<synchronous>, transform_indices = @transform_2, window_bounds = array<i64: 2, 32>}, {transform_indices = @transform_3, window_bounds = array<i64: 1, 3, 32, 32>}, {transform_indices = @transform_4, window_bounds = array<i64: 1, 32, 32>}, {transform_indices = @transform_5, window_bounds = array<i64: 1, 32, 64>}, {transform_indices = @transform_6, window_bounds = array<i64: 1, 1, 64>}, {transform_indices = @transform_7, window_bounds = array<i64: 1, 64, 32>}, {transform_indices = @transform_8, window_bounds = array<i64: 1, 9, 32>}, {transform_indices = @transform_9, window_bounds = array<i64: 1, 1, 32>}]} {
    %c0_i32 = arith.constant 0 : i32
    %0 = arith.cmpi eq, %arg1, %c0_i32 : i32
    %1 = arith.extui %0 : i1 to i32
    %c0_i32_0 = arith.constant 0 : i32
    %2 = arith.cmpi ne, %1, %c0_i32_0 : i32
    scf.if %2 {
      %c0_53 = arith.constant 0 : index
      %c0_54 = arith.constant 0 : index
      %134 = vector.load %arg4[%c0_53, %c0_54] : memref<2x32xf32, #tpu.memory_space<vmem>>, vector<2x32xf32>
      %c0_55 = arith.constant 0 : index
      %c0_56 = arith.constant 0 : index
      %c0_57 = arith.constant 0 : index
      %135 = vector.load %arg2[%c0_55, %c0_56, %c0_57] : memref<1x8x32xf32, #tpu.memory_space<vmem>>, vector<1x8x32xf32>
      %136 = vector.shape_cast %135 : vector<1x8x32xf32> to vector<8x32xf32>
      %c0_58 = arith.constant 0 : index
      %c0_59 = arith.constant 0 : index
      %137 = vector.load %arg3[%c0_58, %c0_59] : memref<8x32xf32, #tpu.memory_space<vmem>>, vector<8x32xf32>
      %138 = arith.addf %136, %137 : vector<8x32xf32>
      %139 = vector.extract_strided_slice %134 {offsets = [0, 0], sizes = [1, 32], strides = [1, 1]} : vector<2x32xf32> to vector<1x32xf32>
      %140 = vector.extract_strided_slice %134 {offsets = [1, 0], sizes = [1, 32], strides = [1, 1]} : vector<2x32xf32> to vector<1x32xf32>
      %cst_60 = arith.constant dense<0.000000e+00> : vector<8xf32>
      %141 = vector.multi_reduction <add>, %138, %cst_60 [1] : vector<8x32xf32> to vector<8xf32>
      %142 = vector.shape_cast %141 : vector<8xf32> to vector<8x1xf32>
      %cst_61 = arith.constant 3.200000e+01 : f32
      %143 = vector.broadcast %cst_61 : f32 to vector<8x1xf32>
      %144 = arith.divf %142, %143 : vector<8x1xf32>
      %145 = vector.broadcast %144 : vector<8x1xf32> to vector<8x32xf32>
      %146 = arith.subf %138, %145 : vector<8x32xf32>
      %147 = arith.mulf %146, %146 : vector<8x32xf32>
      %cst_62 = arith.constant dense<0.000000e+00> : vector<8xf32>
      %148 = vector.multi_reduction <add>, %147, %cst_62 [1] : vector<8x32xf32> to vector<8xf32>
      %149 = vector.shape_cast %148 : vector<8xf32> to vector<8x1xf32>
      %cst_63 = arith.constant 3.200000e+01 : f32
      %150 = vector.broadcast %cst_63 : f32 to vector<8x1xf32>
      %151 = arith.divf %149, %150 : vector<8x1xf32>
      %152 = vector.broadcast %144 : vector<8x1xf32> to vector<8x32xf32>
      %153 = arith.subf %138, %152 : vector<8x32xf32>
      %cst_64 = arith.constant 9.99999996E-13 : f32
      %154 = vector.broadcast %cst_64 : f32 to vector<8x1xf32>
      %155 = arith.addf %151, %154 : vector<8x1xf32>
      %156 = math.rsqrt %155 : vector<8x1xf32>
      %157 = vector.broadcast %156 : vector<8x1xf32> to vector<8x32xf32>
      %158 = arith.mulf %153, %157 : vector<8x32xf32>
      %159 = vector.broadcast %139 : vector<1x32xf32> to vector<8x32xf32>
      %160 = arith.mulf %158, %159 : vector<8x32xf32>
      %161 = vector.broadcast %140 : vector<1x32xf32> to vector<8x32xf32>
      %162 = arith.addf %160, %161 : vector<8x32xf32>
      %c0_65 = arith.constant 0 : index
      %c0_66 = arith.constant 0 : index
      %163 = vector.load %arg12[%c0_65, %c0_66] : memref<8x32xf32, #tpu.memory_space<vmem>>, vector<8x32xf32>
      tpu.vector_store %arg12[%c0_65, %c0_66], %162 {strides = array<i32>} : memref<8x32xf32, #tpu.memory_space<vmem>>, vector<8x32xf32>,
    } else {
    }
    %c0 = arith.constant 0 : index
    %c0_1 = arith.constant 0 : index
    %3 = vector.load %arg12[%c0, %c0_1] : memref<8x32xf32, #tpu.memory_space<vmem>>, vector<8x32xf32>
    %c0_2 = arith.constant 0 : index
    %c0_3 = arith.constant 0 : index
    %c0_4 = arith.constant 0 : index
    %4 = vector.load %arg10[%c0_2, %c0_3, %c0_4] : memref<1x9x32xf32, #tpu.memory_space<vmem>>, vector<1x9x32xf32>
    %5 = vector.shape_cast %4 : vector<1x9x32xf32> to vector<9x32xf32>
    %6 = vector.extract_strided_slice %5 {offsets = [0, 0], sizes = [1, 32], strides = [1, 1]} : vector<9x32xf32> to vector<1x32xf32>
    %7 = vector.extract_strided_slice %5 {offsets = [1, 0], sizes = [1, 32], strides = [1, 1]} : vector<9x32xf32> to vector<1x32xf32>
    %8 = vector.extract_strided_slice %5 {offsets = [2, 0], sizes = [1, 32], strides = [1, 1]} : vector<9x32xf32> to vector<1x32xf32>
    %9 = vector.extract_strided_slice %5 {offsets = [3, 0], sizes = [1, 32], strides = [1, 1]} : vector<9x32xf32> to vector<1x32xf32>
    %10 = vector.extract_strided_slice %5 {offsets = [4, 0], sizes = [1, 32], strides = [1, 1]} : vector<9x32xf32> to vector<1x32xf32>
    %11 = vector.extract_strided_slice %5 {offsets = [5, 0], sizes = [1, 32], strides = [1, 1]} : vector<9x32xf32> to vector<1x32xf32>
    %12 = vector.extract_strided_slice %5 {offsets = [6, 0], sizes = [1, 32], strides = [1, 1]} : vector<9x32xf32> to vector<1x32xf32>
    %13 = vector.extract_strided_slice %5 {offsets = [7, 0], sizes = [1, 32], strides = [1, 1]} : vector<9x32xf32> to vector<1x32xf32>
    %14 = vector.extract_strided_slice %5 {offsets = [8, 0], sizes = [1, 32], strides = [1, 1]} : vector<9x32xf32> to vector<1x32xf32>
    %15 = arith.truncf %3 : vector<8x32xf32> to vector<8x32xbf16>
    %c0_5 = arith.constant 0 : index
    %c0_6 = arith.constant 0 : index
    %c0_7 = arith.constant 0 : index
    %c0_8 = arith.constant 0 : index
    %16 = vector.load %arg5[%c0_5, %c0_6, %c0_7, %c0_8] : memref<1x3x32x32xbf16, #tpu.memory_space<vmem>>, vector<1x1x32x32xbf16>
    %17 = vector.shape_cast %16 : vector<1x1x32x32xbf16> to vector<32x32xbf16>
    %cst = arith.constant dense<0.000000e+00> : vector<8x32xf32>
    %18 = tpu.matmul %15, %17, %cst {dimension_numbers = #tpu.dot_dimension_numbers<[1], [0], [0], [1], [0, 0, 1, 1], [], []>} : vector<8x32xbf16>, vector<32x32xbf16>, vector<8x32xf32> -> vector<8x32xf32>
    %19 = vector.broadcast %6 : vector<1x32xf32> to vector<8x32xf32>
    %20 = arith.addf %18, %19 : vector<8x32xf32>
    %c0_9 = arith.constant 0 : index
    %c1 = arith.constant 1 : index
    %c0_10 = arith.constant 0 : index
    %c0_11 = arith.constant 0 : index
    %21 = vector.load %arg5[%c0_9, %c1, %c0_10, %c0_11] : memref<1x3x32x32xbf16, #tpu.memory_space<vmem>>, vector<1x1x32x32xbf16>
    %22 = vector.shape_cast %21 : vector<1x1x32x32xbf16> to vector<32x32xbf16>
    %cst_12 = arith.constant dense<0.000000e+00> : vector<8x32xf32>
    %23 = tpu.matmul %15, %22, %cst_12 {dimension_numbers = #tpu.dot_dimension_numbers<[1], [0], [0], [1], [0, 0, 1, 1], [], []>} : vector<8x32xbf16>, vector<32x32xbf16>, vector<8x32xf32> -> vector<8x32xf32>
    %24 = vector.broadcast %7 : vector<1x32xf32> to vector<8x32xf32>
    %25 = arith.addf %23, %24 : vector<8x32xf32>
    %c0_13 = arith.constant 0 : index
    %c2 = arith.constant 2 : index
    %c0_14 = arith.constant 0 : index
    %c0_15 = arith.constant 0 : index
    %26 = vector.load %arg5[%c0_13, %c2, %c0_14, %c0_15] : memref<1x3x32x32xbf16, #tpu.memory_space<vmem>>, vector<1x1x32x32xbf16>
    %27 = vector.shape_cast %26 : vector<1x1x32x32xbf16> to vector<32x32xbf16>
    %cst_16 = arith.constant dense<0.000000e+00> : vector<8x32xf32>
    %28 = tpu.matmul %15, %27, %cst_16 {dimension_numbers = #tpu.dot_dimension_numbers<[1], [0], [0], [1], [0, 0, 1, 1], [], []>} : vector<8x32xbf16>, vector<32x32xbf16>, vector<8x32xf32> -> vector<8x32xf32>
    %29 = vector.broadcast %8 : vector<1x32xf32> to vector<8x32xf32>
    %30 = arith.addf %28, %29 : vector<8x32xf32>
    %31 = tpu.transpose %25, [1, 0] : vector<8x32xf32> -> vector<32x8xf32>
    %32 = vector.shape_cast %31 : vector<32x8xf32> to vector<4x8x8xf32>
    %33 = tpu.transpose %30, [1, 0] : vector<8x32xf32> -> vector<32x8xf32>
    %34 = vector.shape_cast %33 : vector<32x8xf32> to vector<4x8x8xf32>
    %35 = tpu.transpose %20, [1, 0] : vector<8x32xf32> -> vector<32x8xf32>
    %36 = vector.shape_cast %35 : vector<32x8xf32> to vector<4x8x8xf32>
    %37 = tpu.transpose %36, [0, 2, 1] : vector<4x8x8xf32> -> vector<4x8x8xf32>
    "tpu.trace_start"() <{level = 10 : i32, message = "hqd,hdk->hqk"}> : () -> ()
    %cst_17 = arith.constant dense<0.000000e+00> : vector<4x8x8xf32>
    %38 = tpu.matmul %37, %32, %cst_17 {dimension_numbers = #tpu.dot_dimension_numbers<[2], [1], [1], [2], [0, 0, 0, 1, 1, 2], [0], [0]>} : vector<4x8x8xf32>, vector<4x8x8xf32>, vector<4x8x8xf32> -> vector<4x8x8xf32>
    "tpu.trace_stop"() : () -> ()
    %cst_18 = arith.constant dense<0xFF800000> : vector<4x8xf32>
    %39 = vector.multi_reduction <maximumf>, %38, %cst_18 [2] : vector<4x8x8xf32> to vector<4x8xf32>
    %40 = vector.shape_cast %39 : vector<4x8xf32> to vector<4x8x1xf32>
    %41 = vector.broadcast %40 : vector<4x8x1xf32> to vector<4x8x8xf32>
    %42 = arith.subf %38, %41 : vector<4x8x8xf32>
    %43 = math.exp %42 : vector<4x8x8xf32>
    %cst_19 = arith.constant dense<0.000000e+00> : vector<4x8xf32>
    %44 = vector.multi_reduction <add>, %43, %cst_19 [2] : vector<4x8x8xf32> to vector<4x8xf32>
    %45 = vector.shape_cast %44 : vector<4x8xf32> to vector<4x8x1xf32>
    %46 = vector.broadcast %45 : vector<4x8x1xf32> to vector<4x8x8xf32>
    %47 = arith.divf %43, %46 : vector<4x8x8xf32>
    "tpu.trace_start"() <{level = 10 : i32, message = "hek,hqk->heq"}> : () -> ()
    %cst_20 = arith.constant dense<0.000000e+00> : vector<4x8x8xf32>
    %48 = tpu.matmul %34, %47, %cst_20 {dimension_numbers = #tpu.dot_dimension_numbers<[2], [2], [1], [1], [0, 0, 0, 1, 1, 1], [0], [0]>} : vector<4x8x8xf32>, vector<4x8x8xf32>, vector<4x8x8xf32> -> vector<4x8x8xf32>
    "tpu.trace_stop"() : () -> ()
    %49 = vector.shape_cast %48 : vector<4x8x8xf32> to vector<32x8xf32>
    %50 = tpu.transpose %49, [1, 0] : vector<32x8xf32> -> vector<8x32xf32>
    %51 = arith.truncf %50 : vector<8x32xf32> to vector<8x32xbf16>
    %c0_21 = arith.constant 0 : index
    %c0_22 = arith.constant 0 : index
    %c0_23 = arith.constant 0 : index
    %52 = vector.load %arg6[%c0_21, %c0_22, %c0_23] : memref<1x32x32xbf16, #tpu.memory_space<vmem>>, vector<1x32x32xbf16>
    %53 = vector.shape_cast %52 : vector<1x32x32xbf16> to vector<32x32xbf16>
    %cst_24 = arith.constant dense<0.000000e+00> : vector<8x32xf32>
    %54 = tpu.matmul %51, %53, %cst_24 {dimension_numbers = #tpu.dot_dimension_numbers<[1], [0], [0], [1], [0, 0, 1, 1], [], []>} : vector<8x32xbf16>, vector<32x32xbf16>, vector<8x32xf32> -> vector<8x32xf32>
    %55 = vector.broadcast %9 : vector<1x32xf32> to vector<8x32xf32>
    %56 = arith.addf %54, %55 : vector<8x32xf32>
    %57 = arith.addf %3, %56 : vector<8x32xf32>
    %cst_25 = arith.constant dense<0.000000e+00> : vector<8xf32>
    %58 = vector.multi_reduction <add>, %57, %cst_25 [1] : vector<8x32xf32> to vector<8xf32>
    %59 = vector.shape_cast %58 : vector<8xf32> to vector<8x1xf32>
    %cst_26 = arith.constant 3.200000e+01 : f32
    %60 = vector.broadcast %cst_26 : f32 to vector<8x1xf32>
    %61 = arith.divf %59, %60 : vector<8x1xf32>
    %62 = vector.broadcast %61 : vector<8x1xf32> to vector<8x32xf32>
    %63 = arith.subf %57, %62 : vector<8x32xf32>
    %64 = arith.mulf %63, %63 : vector<8x32xf32>
    %cst_27 = arith.constant dense<0.000000e+00> : vector<8xf32>
    %65 = vector.multi_reduction <add>, %64, %cst_27 [1] : vector<8x32xf32> to vector<8xf32>
    %66 = vector.shape_cast %65 : vector<8xf32> to vector<8x1xf32>
    %cst_28 = arith.constant 3.200000e+01 : f32
    %67 = vector.broadcast %cst_28 : f32 to vector<8x1xf32>
    %68 = arith.divf %66, %67 : vector<8x1xf32>
    %69 = vector.broadcast %61 : vector<8x1xf32> to vector<8x32xf32>
    %70 = arith.subf %57, %69 : vector<8x32xf32>
    %cst_29 = arith.constant 9.99999996E-13 : f32
    %71 = vector.broadcast %cst_29 : f32 to vector<8x1xf32>
    %72 = arith.addf %68, %71 : vector<8x1xf32>
    %73 = math.rsqrt %72 : vector<8x1xf32>
    %74 = vector.broadcast %73 : vector<8x1xf32> to vector<8x32xf32>
    %75 = arith.mulf %70, %74 : vector<8x32xf32>
    %76 = vector.broadcast %10 : vector<1x32xf32> to vector<8x32xf32>
    %77 = arith.mulf %75, %76 : vector<8x32xf32>
    %78 = vector.broadcast %11 : vector<1x32xf32> to vector<8x32xf32>
    %79 = arith.addf %77, %78 : vector<8x32xf32>
    %80 = arith.truncf %79 : vector<8x32xf32> to vector<8x32xbf16>
    %c0_30 = arith.constant 0 : index
    %c0_31 = arith.constant 0 : index
    %c0_32 = arith.constant 0 : index
    %81 = vector.load %arg7[%c0_30, %c0_31, %c0_32] : memref<1x32x64xbf16, #tpu.memory_space<vmem>>, vector<1x32x64xbf16>
    %82 = vector.shape_cast %81 : vector<1x32x64xbf16> to vector<32x64xbf16>
    %cst_33 = arith.constant dense<0.000000e+00> : vector<8x64xf32>
    %83 = tpu.matmul %80, %82, %cst_33 {dimension_numbers = #tpu.dot_dimension_numbers<[1], [0], [0], [1], [0, 0, 1, 1], [], []>} : vector<8x32xbf16>, vector<32x64xbf16>, vector<8x64xf32> -> vector<8x64xf32>
    %c0_34 = arith.constant 0 : index
    %c0_35 = arith.constant 0 : index
    %c0_36 = arith.constant 0 : index
    %84 = vector.load %arg8[%c0_34, %c0_35, %c0_36] : memref<1x1x64xf32, #tpu.memory_space<vmem>>, vector<1x1x64xf32>
    %85 = vector.shape_cast %84 : vector<1x1x64xf32> to vector<1x64xf32>
    %86 = vector.broadcast %85 : vector<1x64xf32> to vector<8x64xf32>
    %87 = arith.addf %83, %86 : vector<8x64xf32>
    %cst_37 = arith.constant 5.000000e-01 : f32
    %88 = vector.broadcast %cst_37 : f32 to vector<8x64xf32>
    %89 = arith.mulf %88, %87 : vector<8x64xf32>
    %cst_38 = arith.constant 4.471500e-02 : f32
    %90 = vector.broadcast %cst_38 : f32 to vector<8x64xf32>
    %91 = arith.mulf %90, %87 : vector<8x64xf32>
    %92 = arith.mulf %91, %87 : vector<8x64xf32>
    %93 = arith.mulf %92, %87 : vector<8x64xf32>
    %94 = arith.addf %87, %93 : vector<8x64xf32>
    %cst_39 = arith.constant 0.797884583 : f32
    %95 = vector.broadcast %cst_39 : f32 to vector<8x64xf32>
    %96 = arith.mulf %95, %94 : vector<8x64xf32>
    %97 = math.tanh %96 : vector<8x64xf32>
    %cst_40 = arith.constant 1.000000e+00 : f32
    %98 = vector.broadcast %cst_40 : f32 to vector<8x64xf32>
    %99 = arith.addf %98, %97 : vector<8x64xf32>
    %100 = arith.mulf %89, %99 : vector<8x64xf32>
    %101 = arith.truncf %100 : vector<8x64xf32> to vector<8x64xbf16>
    %c0_41 = arith.constant 0 : index
    %c0_42 = arith.constant 0 : index
    %c0_43 = arith.constant 0 : index
    %102 = vector.load %arg9[%c0_41, %c0_42, %c0_43] : memref<1x64x32xbf16, #tpu.memory_space<vmem>>, vector<1x64x32xbf16>
    %103 = vector.shape_cast %102 : vector<1x64x32xbf16> to vector<64x32xbf16>
    %cst_44 = arith.constant dense<0.000000e+00> : vector<8x32xf32>
    %104 = tpu.matmul %101, %103, %cst_44 {dimension_numbers = #tpu.dot_dimension_numbers<[1], [0], [0], [1], [0, 0, 1, 1], [], []>} : vector<8x64xbf16>, vector<64x32xbf16>, vector<8x32xf32> -> vector<8x32xf32>
    %105 = vector.broadcast %12 : vector<1x32xf32> to vector<8x32xf32>
    %106 = arith.addf %104, %105 : vector<8x32xf32>
    %107 = arith.addf %79, %106 : vector<8x32xf32>
    %cst_45 = arith.constant dense<0.000000e+00> : vector<8xf32>
    %108 = vector.multi_reduction <add>, %107, %cst_45 [1] : vector<8x32xf32> to vector<8xf32>
    %109 = vector.shape_cast %108 : vector<8xf32> to vector<8x1xf32>
    %cst_46 = arith.constant 3.200000e+01 : f32
    %110 = vector.broadcast %cst_46 : f32 to vector<8x1xf32>
    %111 = arith.divf %109, %110 : vector<8x1xf32>
    %112 = vector.broadcast %111 : vector<8x1xf32> to vector<8x32xf32>
    %113 = arith.subf %107, %112 : vector<8x32xf32>
    %114 = arith.mulf %113, %113 : vector<8x32xf32>
    %cst_47 = arith.constant dense<0.000000e+00> : vector<8xf32>
    %115 = vector.multi_reduction <add>, %114, %cst_47 [1] : vector<8x32xf32> to vector<8xf32>
    %116 = vector.shape_cast %115 : vector<8xf32> to vector<8x1xf32>
    %cst_48 = arith.constant 3.200000e+01 : f32
    %117 = vector.broadcast %cst_48 : f32 to vector<8x1xf32>
    %118 = arith.divf %116, %117 : vector<8x1xf32>
    %119 = vector.broadcast %111 : vector<8x1xf32> to vector<8x32xf32>
    %120 = arith.subf %107, %119 : vector<8x32xf32>
    %cst_49 = arith.constant 9.99999996E-13 : f32
    %121 = vector.broadcast %cst_49 : f32 to vector<8x1xf32>
    %122 = arith.addf %118, %121 : vector<8x1xf32>
    %123 = math.rsqrt %122 : vector<8x1xf32>
    %124 = vector.broadcast %123 : vector<8x1xf32> to vector<8x32xf32>
    %125 = arith.mulf %120, %124 : vector<8x32xf32>
    %126 = vector.broadcast %13 : vector<1x32xf32> to vector<8x32xf32>
    %127 = arith.mulf %125, %126 : vector<8x32xf32>
    %128 = vector.broadcast %14 : vector<1x32xf32> to vector<8x32xf32>
    %129 = arith.addf %127, %128 : vector<8x32xf32>
    %c0_50 = arith.constant 0 : index
    %c0_51 = arith.constant 0 : index
    %130 = vector.load %arg12[%c0_50, %c0_51] : memref<8x32xf32, #tpu.memory_space<vmem>>, vector<8x32xf32>
    tpu.vector_store %arg12[%c0_50, %c0_51], %129 {strides = array<i32>} : memref<8x32xf32, #tpu.memory_space<vmem>>, vector<8x32xf32>,
    %c1_i32 = arith.constant 1 : i32
    %131 = arith.cmpi eq, %arg1, %c1_i32 : i32
    %132 = arith.extui %131 : i1 to i32
    %c0_i32_52 = arith.constant 0 : i32
    %133 = arith.cmpi ne, %132, %c0_i32_52 : i32
    scf.if %133 {
      %134 = vector.extract_strided_slice %129 {offsets = [0, 0], sizes = [1, 32], strides = [1, 1]} : vector<8x32xf32> to vector<1x32xf32>
      %c0_53 = arith.constant 0 : index
      %c0_54 = arith.constant 0 : index
      %c0_55 = arith.constant 0 : index
      %135 = vector.load %arg11[%c0_53, %c0_54, %c0_55] : memref<1x1x32xf32, #tpu.memory_space<vmem>>, vector<1x1x32xf32>
      %136 = vector.shape_cast %135 : vector<1x1x32xf32> to vector<1x32xf32>
      %137 = vector.shape_cast %134 : vector<1x32xf32> to vector<1x1x32xf32>
      tpu.vector_store %arg11[%c0_53, %c0_54, %c0_55], %137 {strides = array<i32>} : memref<1x1x32xf32, #tpu.memory_space<vmem>>, vector<1x1x32xf32>,
    } else {
    }
    return
  }
  func.func @transform_0(%arg0: i32, %arg1: i32) -> (i32, i32, i32) {
    %c0_i32 = arith.constant 0 : i32
    %c0_i32_0 = arith.constant 0 : i32
    %c0_i32_1 = arith.constant 0 : i32
    return %arg0, %c0_i32, %c0_i32_0 : i32, i32, i32
  }
  func.func @transform_1(%arg0: i32, %arg1: i32) -> (i32, i32) {
    %c0_i32 = arith.constant 0 : i32
    %c0_i32_0 = arith.constant 0 : i32
    %c0_i32_1 = arith.constant 0 : i32
    return %c0_i32, %c0_i32_0 : i32, i32
  }
  func.func @transform_2(%arg0: i32, %arg1: i32) -> (i32, i32) {
    %c0_i32 = arith.constant 0 : i32
    %c0_i32_0 = arith.constant 0 : i32
    %c0_i32_1 = arith.constant 0 : i32
    return %c0_i32, %c0_i32_0 : i32, i32
  }
  func.func @transform_3(%arg0: i32, %arg1: i32) -> (i32, i32, i32, i32) {
    %c0_i32 = arith.constant 0 : i32
    %c0_i32_0 = arith.constant 0 : i32
    %c0_i32_1 = arith.constant 0 : i32
    %c0_i32_2 = arith.constant 0 : i32
    return %arg1, %c0_i32, %c0_i32_0, %c0_i32_1 : i32, i32, i32, i32
  }
  func.func @transform_4(%arg0: i32, %arg1: i32) -> (i32, i32, i32) {
    %c0_i32 = arith.constant 0 : i32
    %c0_i32_0 = arith.constant 0 : i32
    %c0_i32_1 = arith.constant 0 : i32
    return %arg1, %c0_i32, %c0_i32_0 : i32, i32, i32
  }
  func.func @transform_5(%arg0: i32, %arg1: i32) -> (i32, i32, i32) {
    %c0_i32 = arith.constant 0 : i32
    %c0_i32_0 = arith.constant 0 : i32
    %c0_i32_1 = arith.constant 0 : i32
    return %arg1, %c0_i32, %c0_i32_0 : i32, i32, i32
  }
  func.func @transform_6(%arg0: i32, %arg1: i32) -> (i32, i32, i32) {
    %c0_i32 = arith.constant 0 : i32
    %c0_i32_0 = arith.constant 0 : i32
    %c0_i32_1 = arith.constant 0 : i32
    return %arg1, %c0_i32, %c0_i32_0 : i32, i32, i32
  }
  func.func @transform_7(%arg0: i32, %arg1: i32) -> (i32, i32, i32) {
    %c0_i32 = arith.constant 0 : i32
    %c0_i32_0 = arith.constant 0 : i32
    %c0_i32_1 = arith.constant 0 : i32
    return %arg1, %c0_i32, %c0_i32_0 : i32, i32, i32
  }
  func.func @transform_8(%arg0: i32, %arg1: i32) -> (i32, i32, i32) {
    %c0_i32 = arith.constant 0 : i32
    %c0_i32_0 = arith.constant 0 : i32
    %c0_i32_1 = arith.constant 0 : i32
    return %arg1, %c0_i32, %c0_i32_0 : i32, i32, i32
  }
  func.func @transform_9(%arg0: i32, %arg1: i32) -> (i32, i32, i32) {
    %c0_i32 = arith.constant 0 : i32
    %c0_i32_0 = arith.constant 0 : i32
    %c0_i32_1 = arith.constant 0 : i32
    return %arg0, %c0_i32, %c0_i32_0 : i32, i32, i32
  }
}

</mosaic_0001>

<bundles_post_ra>
// kernel: tpu_custom_call.1
= control target key start
LH: loop header
LB: loop body
LE: loop exit
PB: predicated region body
PF: predicated region fallthrough
CT: control target
= control target key end

     0   :  { %s3824_s0 = inlined_call_operand.hbm [shape: f32[2,8,32], index: 0, kind: input, shape index: {}]   ;;  %s3825_s1 = inlined_call_operand.hbm [shape: f32[8,32], index: 1, kind: input, shape index: {}]   ;;  %s3826_s2 = inlined_call_operand.hbm [shape: f32[2,32], index: 2, kind: input, shape index: {}]   ;;  %s3827_s3 = inlined_call_operand.hbm [shape: bf16[2,3,32,32], index: 3, kind: input, shape index: {}]   ;;  %s3828_s4 = inlined_call_operand.hbm [shape: bf16[2,32,32], index: 4, kind: input, shape index: {}]   ;;  %s3829_s5 = inlined_call_operand.hbm [shape: bf16[2,32,64], index: 5, kind: input, shape index: {}]   ;;  %s3830_s6 = inlined_call_operand.hbm [shape: f32[2,1,64], index: 6, kind: input, shape index: {}]   ;;  %s3831_s7 = inlined_call_operand.hbm [shape: bf16[2,64,32], index: 7, kind: input, shape index: {}]   ;;  %s3832_s8 = inlined_call_operand.hbm [shape: f32[2,9,32], index: 8, kind: input, shape index: {}]   ;;  %s3833_s9 = inlined_call_operand.hbm [shape: f32[2,1,32], index: 9, kind: output, shape index: {}]  }
   0x1   :  { %3869 = sst [smem:[#allocation36_spill]] %s3824_s0 }
   0x2   :  { %3870 = sst [smem:[#allocation37_spill]] %s3825_s1 }
   0x3   :  { %3871 = sst [smem:[#allocation38_spill]] %s3826_s2 }
   0x4   :  { %3872 = sst [smem:[#allocation39_spill]] %s3827_s3 }
   0x5   :  { %3873 = sst [smem:[#allocation40_spill]] %s3828_s4 }
   0x6   :  { %3874 = sst [smem:[#allocation41_spill]] %s3829_s5 }
   0x7   :  { %3875 = sst [smem:[#allocation42_spill]] %s3830_s6 }
   0x8   :  { %3876 = sst [smem:[#allocation43_spill]] %s3831_s7 }
   0x9   :  { %3877 = sst [smem:[#allocation44_spill]] %s3832_s8 }
   0xa   :  { %3878 = sst [smem:[#allocation45_spill]] %s3833_s9 }
   0xb   :  { %14 = vsyncpa [#allocation4], 0 }
   0xc   :  { %16 = vsyncpa [#allocation4 + $0x1], 0 }
   0xd   :  { %17 = vsyncpa [#allocation7], 0 }
   0xe   :  { %18 = vsyncpa [#allocation10], 0 }
   0xf   :  { %20 = vsyncpa [#allocation10 + $0x1], 0 }
  0x10   :  { %21 = vsyncpa [#allocation13], 0 }
  0x11   :  { %23 = vsyncpa [#allocation13 + $0x1], 0 }
  0x12   :  { %24 = vsyncpa [#allocation16], 0 }
  0x13   :  { %26 = vsyncpa [#allocation16 + $0x1], 0 }
  0x14   :  { %27 = vsyncpa [#allocation5], 0 }
  0x15   :  { %29 = vsyncpa [#allocation5 + $0x1], 0  ;;  %s3124_s30 = smov 0   ;;  %s3126_s10 = smov 0  }
  0x16   :  { %s3128_s11 = smov 0   ;;  %s3130_s12 = smov 0  }
  0x17   :  { %s3132_s13 = smov 0   ;;  %s3134_s14 = smov 0  }
  0x18   :  { %s3136_s15 = smov 0   ;;  %s3138_s16 = smov 0  }
  0x19   :  { %s3140_s17 = smov 0   ;;  %s3142_s18 = smov 0  }
  0x1a   :  { %s3144_s19 = smov 0  }
  0x1b LB: > { %3879 = sst [smem:[#allocation25_spill]] %s3020_s10  ;;  %s3178_s20 = sadd.s32 4294967295, %s3056_s19   ;;  %s3056_s19 = sphi %s3144_s19, %s35_s19   ;;  %s3052_s18 = sphi %s3142_s18, %s3949_s18   ;;  %s3048_s17 = sphi %s3140_s17, %s3955_s17   ;;  %s3044_s16 = sphi %s3138_s16, %s3947_s16   ;;  %s3040_s15 = sphi %s3136_s15, %s3954_s15   ;;  %s3036_s14 = sphi %s3134_s14, %s3946_s14   ;;  %s3032_s13 = sphi %s3132_s13, %s3953_s13   ;;  %s3028_s12 = sphi %s3130_s12, %s3952_s12   ;;  %s3024_s11 = sphi %s3128_s11, %s3951_s11   ;;  %s3020_s10 = sphi %s3126_s10, %s3950_s10   ;;  %s3016_s30 = sphi %s3124_s30, %s3944_s30  }
  0x1c   : > { %3880 = sst [smem:[#allocation26_spill]] %s3036_s14  ;;  %p3840_p0 = scmp.eq.s32.totalorder %s3056_s19, 0 }
  0x1d   : > { %3881 = sst [smem:[#allocation27_spill]] %s3040_s15  ;;  %p3839_p1 = scmp.eq.s32.totalorder %s3178_s20, 0 }
  0x1e   : > { %3882 = sst [smem:[#allocation28_spill]] %s3044_s16  ;;  %p129_p2 = scmp.ne.s32.totalorder %s3024_s11, %s3020_s10 }
  0x1f   : > { %3883 = sst [smem:[#allocation29_spill]] %s3052_s18  ;;  %p135_p3 = scmp.ne.s32.totalorder %s3020_s10, %s3016_s30 }
  0x20   : > { %p2245_p5 = scmp.ge.s32.totalorder %s3056_s19, 1  ;;  %p131_p6 = por %p129_p2, %p3840_p0 }
  0x21   : > { %p3192_p7 = por %p135_p3, %p3839_p1  ;;  %p302_p8 = scmp.lt.s32.totalorder %s3056_s19, 5 }
  0x22   : > { %s3058_s24 = smov [#allocation6]   ;;  %p3838_p10 = scmp.lt.s32.totalorder %s3056_s19, 4 }
  0x23   : > { %s3884_s22 = scalar_select %p3192_p7, 1, 0 }
  0x24   : > { %p3197_p9 = pnand %p2245_p5, %p302_p8  ;;  %s315_s25 = sshll.u32 %s3058_s24, 4  ;;  %s316_s25 = int_to_ptr.vmem [resolvable:$true] %s315_s25 }
  0x25   : > { %3885 = sst [smem:[#allocation30_spill]] %s3884_s22  ;;  %p3206_p12 = pnand %p3838_p10, %p131_p6 }
  0x26   : > { %s3886_s23 = scalar_select %p3197_p9, 1, 0 }
  0x27   : > { %p2479_p11 = pneg %p3197_p9  ;;  %s3217_s28 = sand.u32 1, %s3056_s19  }
  0x28   : > { %3887 = sst [smem:[#allocation31_spill]] %s3886_s23  ;;  %s3220_s29 = sand.u32 1, %s3024_s11  }
  0x29   : > { %s3888_s26 = scalar_select %p3206_p12, 1, 0 }
  0x2a   : > { %p3212_p13 = pnand %p2479_p11, %p3839_p1  ;;  %s3890_s1 = sld [smem:[#allocation37_spill]] }
  0x2c   : > { %s3889_s27 = scalar_select %p3212_p13, 1, 0 }
  0x2d   : > { %p3846_p3 = pneg %p3212_p13 }
  0x30   : > { %s2652_s21 = scalar_lea.hbm %s3890_s1, 128 }
  0x31   : > { %p2653_p2 = scmp.ne.s32.totalorder %s3890_s1, %s2652_s21  ;;  %p2659_p8 = scmp.lt.u32.totalorder %s2652_s21, %s3890_s1 }
  0x33   : > { %p2655_p5 = pnand %p3846_p3, %p2653_p2 }
  0x35   : > { %p2656_p6 = pneg %p2655_p5 }
  0x37   : > { %p2661_p11 = pnand %p2659_p8, %p2656_p6 }
  0x39   : > { %2664 = shalt.err (!%p2661_p11)
}
  0x3a   : > { %s2665_s10 = scalar_lea.vmem %s316_s25, 128  ;;  %p2673_p0 = scmp.lt.s32.totalorder %s316_s25, %s316_s25 }
  0x3b   : > { %p2666_p10 = scmp.ne.s32.totalorder %s316_s25, %s2665_s10  ;;  %p2674_p7 = scmp.lt.s32.totalorder %s2665_s10, %s2665_s10 }
  0x3d   : > { %p2668_p4 = pnand %p2666_p10, %p3846_p3  ;;  %p2675_p9 = por %p2674_p7, %p2673_p0 }
  0x3f   : > { %p2669_p1 = pneg %p2668_p4 }
  0x41   : > { %p2676_p12 = pnand %p2675_p9, %p2669_p1 }
  0x43   : > { %2679 = shalt.err (!%p2676_p12)
}
  0x44   : > { %2482 = dma.hbm_to_vmem [thread:$0]  (!%p3212_p13), %s3890_s1, 128, %s316_s25, [#allocation7]  }
  0x45   : > { %s2452_s15 = smul.u32 48, %s3220_s29  ;;  %s3247_s22 = sshll.u32 %s3220_s29, 4 }
  0x46   : > { %s2453_s21 = smul.u32 768, %s3048_s17  ;;  %3891 = sst [smem:[#allocation32_spill]] %s3247_s22 }
  0x47   : > { %s3892_s3 = sld [smem:[#allocation39_spill]]  ;;  %s359_s9 = scalar_lea.vmem [#allocation9], %s2452_s15 }
  0x48   : > { %s366_s16 = sshll.u32 %s359_s9, 4  ;;  %s3257_s23 = sshll.u32 %s3048_s17, 8  ;;  %s3254_s16 = int_to_ptr.vmem [resolvable:$true] %s366_s16 }
  0x49   : > { %p3893_p1 = scmp.ne.s32.totalorder %s3888_s26, 0 }
  0x4b   : > { %p3264_p4 = pneg %p3893_p1 }
  0x4d   : > { %s3252_s24 = scalar_lea.hbm %s3892_s3, %s2453_s21  ;;  %s2685_s15 = scalar_lea.hbm %s3892_s3, 1536 }
  0x4e   : > { %s2680_s1 = scalar_lea.hbm %s3252_s24, 768  ;;  %p2686_p10 = scmp.lt.u32.totalorder %s3252_s24, %s3892_s3 }
  0x4f   : > { %p2681_p0 = scmp.ne.s32.totalorder %s3252_s24, %s2680_s1  ;;  %p2687_p12 = scmp.lt.u32.totalorder %s2685_s15, %s2680_s1 }
  0x50   : > { %s3894_s8 = scalar_select %p3264_p4, 1, 0 }
  0x51   : > { %p2683_p7 = pnand %p3264_p4, %p2681_p0  ;;  %p2688_p2 = por %p2687_p12, %p2686_p10 }
  0x52   : > { %p2689_p5 = scmp.lt.u32.totalorder %s2680_s1, %s3252_s24 }
  0x53   : > { %p2684_p9 = pneg %p2683_p7 }
  0x54   : > { %p2690_p6 = por %p2689_p5, %p2688_p2 }
  0x56   : > { %p2691_p8 = pnand %p2690_p6, %p2684_p9 }
  0x58   : > { %2694 = shalt.err (!%p2691_p8)
}
  0x59   : > { %s2695_s25 = scalar_lea.vmem %s3254_s16, 768  ;;  %s3059_s21 = smov [#allocation9]  }
  0x5a   : > { %p2696_p11 = scmp.ne.s32.totalorder %s3254_s16, %s2695_s25  ;;  %s2700_s10 = sshll.u32 %s3059_s21, 4  ;;  %s2701_s10 = int_to_ptr.vmem [resolvable:$false] %s2700_s10 }
  0x5b   : > { %s2702_s30 = scalar_lea.vmem %s2701_s10, 1536  ;;  %p2703_p3 = scmp.lt.s32.totalorder %s3254_s16, %s2701_s10 }
  0x5c   : > { %p2698_p0 = pnand %p2696_p11, %p3264_p4  ;;  %p2704_p13 = scmp.lt.s32.totalorder %s2702_s30, %s2695_s25 }
  0x5e   : > { %p2699_p7 = pneg %p2698_p0  ;;  %p2705_p10 = por %p2704_p13, %p2703_p3 }
  0x60   : > { %p2706_p12 = pnand %p2705_p10, %p2699_p7 }
  0x62   : > { %2709 = shalt.err (!%p2706_p12)
}
  0x63   : > { %s3859_s1 = smov 64   ;;  %s3860_s15 = smov 4  }
  0x64   : > { %s3895_s9 = scalar_lea.sflag [#allocation10], %s3217_s28  ;;  %s3896_s5 = sld [smem:[#allocation41_spill]] }
  0x65   : > { %2492 = dma.hbm_to_vmem [thread:$0]  (!%p3893_p1), %s3252_s24, 768, %s3254_s16, %s3895_s9, %s3859_s1, %s3859_s1, %s3860_s15  }
  0x66   : > { %s401_s30 = scalar_lea.vmem [#allocation12], %s3247_s22  ;;  %s3854_s6 = scalar_lea.sflag [#allocation13], %s3217_s28 }
  0x67   : > { %s408_s3 = sshll.u32 %s401_s30, 4  ;;  %s3299_s3 = int_to_ptr.vmem [resolvable:$true] %s408_s3 }
  0x6a   : > { %s3296_s10 = scalar_lea.hbm %s3896_s5, %s3257_s23  ;;  %s2715_s9 = scalar_lea.hbm %s3896_s5, 512 }
  0x6b   : > { %s2710_s4 = scalar_lea.hbm %s3296_s10, 256  ;;  %p2716_p2 = scmp.lt.u32.totalorder %s3296_s10, %s3896_s5 }
  0x6c   : > { %p2711_p13 = scmp.ne.s32.totalorder %s3296_s10, %s2710_s4  ;;  %p2717_p5 = scmp.lt.u32.totalorder %s2715_s9, %s2710_s4 }
  0x6d   : > { %p2719_p8 = scmp.lt.u32.totalorder %s2710_s4, %s3296_s10 }
  0x6e   : > { %p2713_p3 = pnand %p2711_p13, %p3264_p4  ;;  %p2718_p6 = por %p2717_p5, %p2716_p2 }
  0x70   : > { %p2714_p9 = pneg %p2713_p3  ;;  %p2720_p11 = por %p2719_p8, %p2718_p6 }
  0x72   : > { %p2721_p0 = pnand %p2720_p11, %p2714_p9 }
  0x74   : > { %2724 = shalt.err (!%p2721_p0)
}
  0x75   : > { %s2725_s30 = scalar_lea.vmem %s3299_s3, 256  ;;  %s3062_s24 = smov [#allocation12]  }
  0x76   : > { %p2726_p7 = scmp.ne.s32.totalorder %s3299_s3, %s2725_s30  ;;  %s2730_s16 = sshll.u32 %s3062_s24, 4  ;;  %s2731_s16 = int_to_ptr.vmem [resolvable:$false] %s2730_s16 }
  0x77   : > { %s2732_s25 = scalar_lea.vmem %s2731_s16, 512  ;;  %p2733_p13 = scmp.lt.s32.totalorder %s3299_s3, %s2731_s16 }
  0x78   : > { %p2728_p10 = pnand %p2726_p7, %p3264_p4  ;;  %p2734_p3 = scmp.lt.s32.totalorder %s2732_s25, %s2725_s30 }
  0x7a   : > { %p2729_p12 = pneg %p2728_p10  ;;  %p2735_p2 = por %p2734_p3, %p2733_p13 }
  0x7c   : > { %p2736_p5 = pnand %p2735_p2, %p2729_p12 }
  0x7e   : > { %2739 = shalt.err (!%p2736_p5)
}
  0x7f   : > { %2498 = dma.hbm_to_vmem [thread:$0]  (!%p3893_p1), %s3296_s10, 256, %s3299_s3, %s3854_s6, %s3859_s1, %s3859_s1, %s3860_s15  }
  0x80   : > { %s2259_s4 = sshll.u32 %s3220_s29, 5  ;;  %s2322_s9 = sshll.u32 %s3048_s17, 9 }
  0x81   : > { %s3897_s7 = sld [smem:[#allocation43_spill]]  ;;  %s439_s16 = scalar_lea.vmem [#allocation15], %s2259_s4 }
  0x82   : > { %s446_s25 = sshll.u32 %s439_s16, 4  ;;  %s3063_s5 = smov [#allocation8]   ;;  %s3335_s25 = int_to_ptr.vmem [resolvable:$true] %s446_s25 }
  0x83   : > { %s3337_s22 = sshll.u32 %s3063_s5, 4  ;;  %s3858_s0 = scalar_lea.sflag [#allocation16], %s3217_s28  ;;  %s327_s22 = int_to_ptr.vmem [resolvable:$true] %s3337_s22 }
  0x87   : > { %s3333_s24 = scalar_lea.hbm %s3897_s7, %s2322_s9  ;;  %s2745_s21 = scalar_lea.hbm %s3897_s7, 1024 }
  0x88   : > { %s2740_s3 = scalar_lea.hbm %s3333_s24, 512  ;;  %p2746_p11 = scmp.lt.u32.totalorder %s3333_s24, %s3897_s7 }
  0x89   : > { %p2741_p9 = scmp.ne.s32.totalorder %s3333_s24, %s2740_s3  ;;  %p2747_p0 = scmp.lt.u32.totalorder %s2745_s21, %s2740_s3 }
  0x8a   : > { %p2749_p10 = scmp.lt.u32.totalorder %s2740_s3, %s3333_s24 }
  0x8b   : > { %p2743_p6 = pnand %p2741_p9, %p3264_p4  ;;  %p2748_p7 = por %p2747_p0, %p2746_p11 }
  0x8d   : > { %p2744_p8 = pneg %p2743_p6  ;;  %p2750_p12 = por %p2749_p10, %p2748_p7 }
  0x8f   : > { %p2751_p13 = pnand %p2750_p12, %p2744_p8 }
  0x91   : > { %2754 = shalt.err (!%p2751_p13)
}
  0x92   : > { %s2755_s5 = scalar_lea.vmem %s3335_s25, 512  ;;  %s3064_s4 = smov [#allocation15]  }
  0x93   : > { %p2756_p3 = scmp.ne.s32.totalorder %s3335_s25, %s2755_s5  ;;  %s2760_s16 = sshll.u32 %s3064_s4, 4  ;;  %s2761_s16 = int_to_ptr.vmem [resolvable:$false] %s2760_s16 }
  0x94   : > { %s2762_s6 = scalar_lea.vmem %s2761_s16, 1024  ;;  %p2763_p9 = scmp.lt.s32.totalorder %s3335_s25, %s2761_s16 }
  0x95   : > { %p2758_p2 = pnand %p2756_p3, %p3264_p4  ;;  %p2764_p6 = scmp.lt.s32.totalorder %s2762_s6, %s2755_s5 }
  0x97   : > { %p2759_p5 = pneg %p2758_p2  ;;  %p2765_p11 = por %p2764_p6, %p2763_p9 }
  0x99   : > { %p2766_p0 = pnand %p2765_p11, %p2759_p5 }
  0x9b   : > { %2769 = shalt.err (!%p2766_p0)
}
  0x9c   : > { %2504 = dma.hbm_to_vmem [thread:$0]  (!%p3893_p1), %s3333_s24, 512, %s3335_s25, %s3858_s0, %s3859_s1, %s3859_s1, %s3860_s15  }
  0x9d   : > { %s3898_s2 = sld [smem:[#allocation38_spill]]  ;;  %p3899_p7 = scmp.ne.s32.totalorder %s3889_s27, 0 }
  0x9f   : > { %p3900_p10 = pneg %p3899_p7 }
  0xa3   : > { %s2770_s9 = scalar_lea.hbm %s3898_s2, 32 }
  0xa4   : > { %p2771_p8 = scmp.ne.s32.totalorder %s3898_s2, %s2770_s9  ;;  %p2777_p3 = scmp.lt.u32.totalorder %s2770_s9, %s3898_s2 }
  0xa6   : > { %p2773_p12 = pnand %p2771_p8, %p3900_p10 }
  0xa8   : > { %p2774_p13 = pneg %p2773_p12 }
  0xaa   : > { %p2779_p2 = pnand %p2777_p3, %p2774_p13 }
  0xac   : > { %2782 = shalt.err (!%p2779_p2)
}
  0xad   : > { %s2783_s24 = scalar_lea.vmem %s327_s22, 32  ;;  %p3901_p9 = pmov %p3900_p10 }
  0xae   : > { %p2784_p5 = scmp.ne.s32.totalorder %s327_s22, %s2783_s24  ;;  %p2791_p0 = scmp.lt.s32.totalorder %s327_s22, %s327_s22 }
  0xaf   : > { %p2792_p1 = scmp.lt.s32.totalorder %s2783_s24, %s2783_s24 }
  0xb0   : > { %p2786_p6 = pnand %p2784_p5, %p3901_p9 }
  0xb1   : > { %p2793_p4 = por %p2792_p1, %p2791_p0 }
  0xb2   : > { %p2787_p11 = pneg %p2786_p6 }
  0xb4   : > { %p2794_p8 = pnand %p2793_p4, %p2787_p11 }
  0xb6   : > { %2797 = shalt.err (!%p2794_p8)
}
  0xb7   : > { %2485 = dma.hbm_to_vmem [thread:$0]  (!%p3899_p7), %s3898_s2, 32, %s327_s22, [#allocation7]  }
  0xb8   : > { %s2244_s27 = sadd.s32 4294967294, %s3056_s19   ;;  %s44_s6 = sadd.s32 1, %s3048_s17 }
  0xb9   : > { %s47_s3 = sadd.s32 1, %s3052_s18  ;;  %p45_p1 = scmp.ge.s32.totalorder %s44_s6, 2 }
  0xba   : > { %s54_s10 = sadd.s32 1, %s3036_s14  ;;  %p61_p4 = scmp.ne.s32.totalorder %s3036_s14, %s3032_s13 }
  0xbb   : > { %p67_p10 = scmp.ne.s32.totalorder %s3032_s13, %s3028_s12  ;;  %s3957_s6 = smov (%p45_p1, %s44_s6), 0 }
  0xbc   : > { %3902 = sst [smem:[#allocation33_spill]] %s3957_s6  ;;  %s3959_s3 = smov (!%p45_p1, %s47_s3), %s3052_s18 }
  0xbd   : > { %p3903_p12 = scmp.eq.s32.totalorder %s3056_s19, 0  ;;  %p3905_p13 = scmp.eq.s32.totalorder %s3178_s20, 0 }
  0xbe   : > { %p49_p2 = scmp.ge.s32.totalorder %s3959_s3, 2  ;;  %s119_s21 = ssub.s32 %s3048_s17, %s3957_s6 }
  0xbf   : > { %p3400_p7 = por %p3903_p12, %p61_p4  ;;  %p3409_p3 = por %p3905_p13, %p67_p10 }
  0xc0   : > { %p120_p5 = scmp.eq.s32.totalorder %s119_s21, 0  ;;  %p3907_p9 = scmp.eq.s32.totalorder %s3178_s20, 3 }
  0xc1   : > { %s3906_s9 = scalar_select %p3409_p3, 1, 0 }
  0xc2   : > { %p3417_p6 = por %p3907_p9, %p61_p4  ;;  %s3961_s3 = smov (%p49_p2, %s3959_s3), 0 }
  0xc3   : > { %3909 = sst [smem:[#allocation34_spill]] %s3961_s3  ;;  %s3910_s5 = sadd.s32 1, %s3024_s11 }
  0xc4   : > { %s3908_s30 = scalar_select %p3417_p6, 1, 0 }
  0xc5   : > { %s3426_s4 = scalar_select %p120_p5, %s3024_s11, %s3910_s5  }
  0xc6   : > { %s51_s24 = ssub.s32 %s3052_s18, %s3961_s3  ;;  %p295_p11 = scmp.eq.s32.totalorder %s2244_s27, 3 }
  0xc7   : > { %p52_p0 = scmp.eq.s32.totalorder %s51_s24, 0  ;;  %s337_s25 = sand.u32 1, %s3036_s14  }
  0xc8   : > { %p3434_p8 = por %p295_p11, %p67_p10  ;;  %s2249_s0 = sshll.u32 %s337_s25, 3 }
  0xc9   : > { %s3439_s21 = scalar_select %p52_p0, %s3036_s14, %s54_s10  }
  0xca   : > { %s3911_s16 = scalar_select %p3434_p8, 1, 0 }
  0xcb   : > { %3912 = sst [smem:[#allocation35_spill]] %s3439_s21  ;;  %s2250_s1 = sshll.u32 %s3052_s18, 7 }
  0xcc   : > { %s3913_s7 = sld [smem:[#allocation36_spill]]  ;;  %s341_s27 = scalar_lea.vmem [#allocation3], %s2249_s0 }
  0xcd   : > { %s348_s5 = sshll.u32 %s341_s27, 4  ;;  %p3914_p1 = scmp.lt.s32.totalorder %s3056_s19, 4  ;;  %s3455_s5 = int_to_ptr.vmem [resolvable:$true] %s348_s5 }
  0xce   : > { %s338_s3 = scalar_lea.sflag [#allocation4], %s337_s25 }
  0xcf   : > { %p3451_p4 = pnand %p3914_p1, %p3400_p7 }
  0xd1   : > { %p2800_p12 = pneg %p3451_p4 }
  0xd2   : > { %s3445_s6 = scalar_lea.hbm %s3913_s7, %s2250_s1  ;;  %s3916_s1 = sld [smem:[#allocation40_spill]] }
  0xd3   : > { %s2798_s18 = scalar_lea.hbm %s3445_s6, 128  ;;  %s2803_s27 = scalar_lea.hbm %s3913_s7, 256 }
  0xd4   : > { %p2799_p10 = scmp.ne.s32.totalorder %s3445_s6, %s2798_s18  ;;  %p2804_p2 = scmp.lt.u32.totalorder %s3445_s6, %s3913_s7 }
  0xd5   : > { %p2805_p5 = scmp.lt.u32.totalorder %s2803_s27, %s2798_s18  ;;  %p2807_p11 = scmp.lt.u32.totalorder %s2798_s18, %s3445_s6 }
  0xd6   : > { %p2801_p7 = pnand %p2800_p12, %p2799_p10 }
  0xd7   : > { %p2806_p9 = por %p2805_p5, %p2804_p2 }
  0xd8   : > { %s3461_s15 = scalar_lea.hbm %s3916_s1, %s3257_s23  ;;  %p2802_p13 = pneg %p2801_p7 }
  0xd9   : > { %p2808_p0 = por %p2807_p11, %p2806_p9 }
  0xdb   : > { %p2809_p1 = pnand %p2808_p0, %p2802_p13 }
  0xdd   : > { %2812 = shalt.err (!%p2809_p1)
}
  0xde   : > { %s2813_s25 = scalar_lea.vmem %s3455_s5, 128  ;;  %s3065_s10 = smov [#allocation3]  }
  0xdf   : > { %p2814_p10 = scmp.ne.s32.totalorder %s3455_s5, %s2813_s25  ;;  %s2818_s2 = sshll.u32 %s3065_s10, 4  ;;  %s2819_s2 = int_to_ptr.vmem [resolvable:$false] %s2818_s2 }
  0xe0   : > { %s2820_s14 = scalar_lea.vmem %s2819_s2, 256  ;;  %p2821_p6 = scmp.lt.s32.totalorder %s3455_s5, %s2819_s2 }
  0xe1   : > { %p2816_p7 = pnand %p2814_p10, %p2800_p12  ;;  %p2822_p2 = scmp.lt.s32.totalorder %s2820_s14, %s2813_s25 }
  0xe3   : > { %p2817_p8 = pneg %p2816_p7  ;;  %p2823_p5 = por %p2822_p2, %p2821_p6 }
  0xe5   : > { %p2824_p9 = pnand %p2823_p5, %p2817_p8 }
  0xe7   : > { %2827 = shalt.err (!%p2824_p9)
}
  0xe8   : > { %s3917_s18 = sld [smem:[#allocation32_spill]]  ;;  %s2258_s22 = sshll.u32 %s3048_s17, 4 }
  0xe9   : > { %2489 = dma.hbm_to_vmem [thread:$0]  (!%p3451_p4), %s3445_s6, 128, %s3455_s5, %s338_s3  }
  0xea   : > { %s2828_s27 = scalar_lea.hbm %s3461_s15, 256  ;;  %p3918_p8 = scmp.ne.s32.totalorder %s3894_s8, 0 }
  0xeb   : > { %p2829_p6 = scmp.ne.s32.totalorder %s3461_s15, %s2828_s27  ;;  %s2833_s10 = scalar_lea.hbm %s3916_s1, 512 }
  0xec   : > { %p2834_p11 = scmp.lt.u32.totalorder %s3461_s15, %s3916_s1  ;;  %p2835_p0 = scmp.lt.u32.totalorder %s2833_s10, %s2828_s27 }
  0xed   : > { %p2831_p12 = pnand %p2829_p6, %p3918_p8  ;;  %p2837_p1 = scmp.lt.u32.totalorder %s2828_s27, %s3461_s15 }
  0xee   : > { %s380_s21 = scalar_lea.vmem [#allocation11], %s3917_s18  ;;  %p2836_p4 = por %p2835_p0, %p2834_p11 }
  0xef   : > { %s387_s0 = sshll.u32 %s380_s21, 4  ;;  %p2832_p13 = pneg %p2831_p12  ;;  %s3489_s0 = int_to_ptr.vmem [resolvable:$true] %s387_s0 }
  0xf0   : > { %p2838_p10 = por %p2837_p1, %p2836_p4 }
  0xf2   : > { %p2839_p7 = pnand %p2838_p10, %p2832_p13 }
  0xf4   : > { %2842 = shalt.err (!%p2839_p7)
}
  0xf5   : > { %s2843_s6 = scalar_lea.vmem %s3489_s0, 256  ;;  %s3066_s3 = smov [#allocation11]  }
  0xf6   : > { %p2844_p2 = scmp.ne.s32.totalorder %s3489_s0, %s2843_s6  ;;  %s2848_s5 = sshll.u32 %s3066_s3, 4  ;;  %s2849_s5 = int_to_ptr.vmem [resolvable:$false] %s2848_s5 }
  0xf7   : > { %s2850_s21 = scalar_lea.vmem %s2849_s5, 512  ;;  %p2851_p6 = scmp.lt.s32.totalorder %s3489_s0, %s2849_s5 }
  0xf8   : > { %p2846_p5 = pnand %p2844_p2, %p3918_p8  ;;  %p2852_p12 = scmp.lt.s32.totalorder %s2850_s21, %s2843_s6 }
  0xfa   : > { %p2847_p9 = pneg %p2846_p5  ;;  %p2853_p11 = por %p2852_p12, %p2851_p6 }
  0xfc   : > { %p2854_p0 = pnand %p2853_p11, %p2847_p9 }
  0xfe   : > { %2857 = shalt.err (!%p2854_p0)
}
  0xff   : > { %p3919_p13 = scmp.ne.s32.totalorder %s3888_s26, 0  ;;  %s3920_s27 = smov 4  }
 0x100   : > { %s3921_s24 = smov 64   ;;  %s3922_s25 = scalar_lea.sflag [#allocation10], %s3217_s28 }
 0x101   : > { %2495 = dma.hbm_to_vmem [thread:$0]  (!%p3919_p13), %s3461_s15, 256, %s3489_s0, %s3922_s25, %s3921_s24, %s3921_s24, %s3920_s27  }
 0x102   : > { %s3923_s14 = sld [smem:[#allocation42_spill]]  ;;  %s421_s5 = scalar_lea.vmem [#allocation14], %s3220_s29 }
 0x103   : > { %s428_s21 = sshll.u32 %s421_s5, 4  ;;  %s429_s21 = int_to_ptr.vmem [resolvable:$true] %s428_s21 }
 0x108   : > { %s3924_s6 = smov %s3923_s14  ;;  %s3523_s3 = scalar_lea.hbm %s3923_s14, %s2258_s22 }
 0x109   : > { %s2858_s1 = scalar_lea.hbm %s3523_s3, 16  ;;  %s2863_s0 = scalar_lea.hbm %s3924_s6, 32 }
 0x10a   : > { %p2859_p4 = scmp.ne.s32.totalorder %s3523_s3, %s2858_s1  ;;  %p2864_p7 = scmp.lt.u32.totalorder %s3523_s3, %s3924_s6 }
 0x10b   : > { %p2865_p2 = scmp.lt.u32.totalorder %s2863_s0, %s2858_s1  ;;  %p2867_p9 = scmp.lt.u32.totalorder %s2858_s1, %s3523_s3 }
 0x10c   : > { %p2861_p1 = pnand %p2859_p4, %p3918_p8 }
 0x10d   : > { %p2866_p5 = por %p2865_p2, %p2864_p7 }
 0x10e   : > { %p2862_p10 = pneg %p2861_p1 }
 0x10f   : > { %p2868_p6 = por %p2867_p9, %p2866_p5 }
 0x111   : > { %p2869_p12 = pnand %p2868_p6, %p2862_p10 }
 0x113   : > { %2872 = shalt.err (!%p2869_p12)
}
 0x114   : > { %s2873_s29 = scalar_lea.vmem %s429_s21, 16  ;;  %s3067_s22 = smov [#allocation14]  }
 0x115   : > { %p2874_p11 = scmp.ne.s32.totalorder %s429_s21, %s2873_s29  ;;  %s2878_s25 = sshll.u32 %s3067_s22, 4  ;;  %s2879_s25 = int_to_ptr.vmem [resolvable:$false] %s2878_s25 }
 0x116   : > { %s2880_s7 = scalar_lea.vmem %s2879_s25, 32  ;;  %p2881_p1 = scmp.lt.s32.totalorder %s429_s21, %s2879_s25 }
 0x117   : > { %p2876_p0 = pnand %p2874_p11, %p3918_p8  ;;  %p2882_p3 = scmp.lt.s32.totalorder %s2880_s7, %s2873_s29 }
 0x119   : > { %p2877_p4 = pneg %p2876_p0  ;;  %p2883_p13 = por %p2882_p3, %p2881_p1 }
 0x11b   : > { %p2884_p2 = pnand %p2883_p13, %p2877_p4 }
 0x11d   : > { %2887 = shalt.err (!%p2884_p2)
}
 0x11e   : > { %p3925_p7 = scmp.ne.s32.totalorder %s3888_s26, 0  ;;  %s3926_s1 = scalar_lea.sflag [#allocation13], %s3217_s28 }
 0x11f   : > { %s3927_s14 = sld [smem:[#allocation44_spill]]  ;;  %s460_s0 = scalar_lea.vmem [#allocation17], %s3917_s18 }
 0x120   : > { %2501 = dma.hbm_to_vmem [thread:$0]  (!%p3925_p7), %s3523_s3, 16, %s429_s21, %s3926_s1  }
 0x121   : > { %s467_s27 = sshll.u32 %s460_s0, 4  ;;  %s3552_s27 = int_to_ptr.vmem [resolvable:$true] %s467_s27 }
 0x125   : > { %s3928_s5 = smov %s3927_s14  ;;  %s3549_s15 = scalar_lea.hbm %s3927_s14, %s3257_s23 }
 0x126   : > { %s2888_s24 = scalar_lea.hbm %s3549_s15, 256  ;;  %s2893_s21 = scalar_lea.hbm %s3928_s5, 512 }
 0x127   : > { %p2889_p3 = scmp.ne.s32.totalorder %s3549_s15, %s2888_s24  ;;  %p2894_p5 = scmp.lt.u32.totalorder %s3549_s15, %s3928_s5 }
 0x128   : > { %p2895_p9 = scmp.lt.u32.totalorder %s2893_s21, %s2888_s24  ;;  %p2897_p12 = scmp.lt.u32.totalorder %s2888_s24, %s3549_s15 }
 0x129   : > { %p2891_p13 = pnand %p2889_p3, %p3918_p8 }
 0x12a   : > { %p2896_p6 = por %p2895_p9, %p2894_p5 }
 0x12b   : > { %p2892_p10 = pneg %p2891_p13 }
 0x12c   : > { %p2898_p11 = por %p2897_p12, %p2896_p6 }
 0x12e   : > { %p2899_p0 = pnand %p2898_p11, %p2892_p10 }
 0x130   : > { %2902 = shalt.err (!%p2899_p0)
}
 0x131   : > { %s2903_s18 = scalar_lea.vmem %s3552_s27, 256  ;;  %s3068_s25 = smov [#allocation17]  }
 0x132   : > { %p2904_p4 = scmp.ne.s32.totalorder %s3552_s27, %s2903_s18  ;;  %s2908_s7 = sshll.u32 %s3068_s25, 4  ;;  %s2909_s7 = int_to_ptr.vmem [resolvable:$false] %s2908_s7 }
 0x133   : > { %s2910_s1 = scalar_lea.vmem %s2909_s7, 512  ;;  %p2911_p3 = scmp.lt.s32.totalorder %s3552_s27, %s2909_s7 }
 0x134   : > { %p2906_p1 = pnand %p2904_p4, %p3918_p8  ;;  %p2912_p13 = scmp.lt.s32.totalorder %s2910_s1, %s2903_s18 }
 0x136   : > { %p2907_p2 = pneg %p2906_p1  ;;  %p2913_p5 = por %p2912_p13, %p2911_p3 }
 0x138   : > { %p2914_p9 = pnand %p2913_p5, %p2907_p2 }
 0x13a   : > { %2917 = shalt.err (!%p2914_p9)
}
 0x13b   : > { %s3069_s10 = smov 128   ;;  %s3070_s2 = smov 8  }
 0x13c   : > { %s3929_s14 = scalar_lea.sflag [#allocation16], %s3217_s28  ;;  %s3930_s8 = sld [smem:[#allocation31_spill]] }
 0x13d   : > { %2507 = dma.hbm_to_vmem [thread:$0]  (!%p3925_p7), %s3549_s15, 256, %s3552_s27, %s3929_s14, %s3069_s10, %s3069_s10, %s3070_s2  }
 0x142   : > { %p3931_p8 = scmp.ne.s32.totalorder %s3930_s8, 0 }
 0x143   : > { %s3580_s0 = sand.u32 (!%p3931_p8), 1, %s3032_s13   ;;  %p3932_p10 = scmp.ne.s32.totalorder (!%p3931_p8), %s3906_s9, 0 }
 0x144   : > { %479 = sbr.rel (%p3931_p8) target bundleno = 3390 (0xd3e), region = 56  ;;  %s2266_s24 = sshll.u32 (!%p3931_p8), %s3580_s0, 3 }
 0x145   : > { %s482_s29 = scalar_lea.sflag (!%p3931_p8), [#allocation4], %s3580_s0  ;;  %s485_s3 = scalar_lea.vmem (!%p3931_p8), [#allocation3], %s2266_s24 }
 0x14b   : > { %2991 = dma.done.wait (%p3932_p10), %s482_s29, 128  }
 0x14c   : > { %2993 = vsyncadd (%p3932_p10), %s482_s29, 4294967168  ;;  %p3933_p6 = scmp.eq.s32.totalorder %s3178_s20, 0 }
 0x14e   : > { %2995 = dma.done.wait (%p3933_p6), [#allocation7], 160   ;;  %p3934_p7 = pmov %p3933_p6 }
 0x14f   : > { %s3935_s26 = sld [smem:[#allocation25_spill]]  ;;  %s498_s15 = sand.u32 1, %s3178_s20  }
 0x150   : > { %2997 = vsyncadd (%p3934_p7), [#allocation7], 4294967136  ;;  %s3936_s28 = sld [smem:[#allocation30_spill]]  ;;  %s499_s22 = scalar_lea.sflag [#allocation10], %s498_s15 }
 0x155   : > { %s3594_s27 = sand.u32 1, %s3935_s26  }
 0x156   : > { %s2454_s21 = smul.u32 48, %s3594_s27  ;;  %p3937_p12 = scmp.ne.s32.totalorder %s3936_s28, 0 }
 0x158   : > { %s3597_s23 = scalar_lea.vmem [#allocation9], %s2454_s21 }
 0x159   : > { %2999 = dma.done.wait (%p3937_p12), %s499_s22, 1024  }
 0x15a   : > { %3001 = vsyncadd (%p3937_p12), %s499_s22, 4294966272  ;;  %s3604_s9 = sshll.u32 %s3594_s27, 4  ;;  %s517_s20 = scalar_lea.sflag [#allocation13], %s498_s15 }
 0x15b   : > { %s511_s18 = scalar_lea.vmem [#allocation11], %s3604_s9  ;;  %s520_s25 = scalar_lea.vmem [#allocation12], %s3604_s9 }
 0x15c   : > { %3003 = dma.done.wait (%p3937_p12), %s517_s20, 272  }
 0x15d   : > { %3005 = vsyncadd (%p3937_p12), %s517_s20, 4294967024  ;;  %s2271_s7 = sshll.u32 %s3594_s27, 5  ;;  %s528_s1 = scalar_lea.vmem [#allocation14], %s3594_s27 }
 0x15e   : > { %s534_s10 = scalar_lea.sflag [#allocation16], %s498_s15  ;;  %s3614_s2 = scalar_lea.vmem [#allocation15], %s2271_s7 }
 0x15f   : > { %3007 = dma.done.wait (%p3937_p12), %s534_s10, 768  }
 0x160   : > { %3009 = vsyncadd (%p3937_p12), %s534_s10, 4294966528  ;;  %s546_s14 = scalar_lea.vmem [#allocation17], %s3604_s9  ;;  %s608_s8 = scalar_lea.vmem [#allocation18], %s3580_s0 }
 0x161   : > { %s3938_s24 = sld [smem:[#allocation27_spill]] }
 0x167   : > { %p2273_p11 = scmp.ne.s32.totalorder %s3938_s24, 0 }
 0x168   : > { %v615_v0 = vld [vmem:[%s485_s3] sm:$0xff] (!%p2273_p11)  ;;  %v616_v1 = vld [vmem:[#allocation6] sm:$0xff] (!%p2273_p11)  ;;  %vm618_vm0 = vcmask (!%p2273_p11), 261120   ;;  %v633_v11 = vlaneseq (!%p2273_p11)  ;;  %v614_v15 = vld [vmem:[#allocation8] sm:$0x3] (!%p2273_p11) }
 0x169   : > { %613 = sbr.rel (%p2273_p11) target bundleno = 677 (0x2a5), region = 96  ;;  %v617_v2 = vadd.f32 (!%p2273_p11), %v616_v1, %v615_v0 }
 0x16a   : > { %v634_v13 = vshrl.u32 (!%p2273_p11), %v633_v11, 7 }
 0x16b   : > { %v619_v3 = vsel (!%p2273_p11), %vm618_vm0, %v617_v2, 0.0 }
 0x16c   : > { %620 = vadd.xlane.f32.xlu0 (!%p2273_p11), %v619_v3  ;;  %v635_v14 = vsub.s32 (!%p2273_p11), 0, %v634_v13  ;;  %v640_v16 = vsub.s32 (!%p2273_p11), 1, %v634_v13 }
 0x16e   : > { %v636_v17 = vrot.slane (!%p2273_p11), %v614_v15, %v635_v14  ;;  %v641_v20 = vrot.slane (!%p2273_p11), %v614_v15, %v640_v16 }
 0x1f9   : > { %v621_v4 = vpop.xlane.xlu0 %620 }
 0x1fa   : > { %v623_v5 = vmul.f32 0.03125, %v621_v4 }
 0x1fc   : > { %v624_v6 = vsub.f32 %v617_v2, %v623_v5 }
 0x1fe   : > { %v625_v7 = vmul.f32 %v624_v6, %v624_v6 }
 0x200   : > { %v626_v8 = vsel %vm618_vm0, %v625_v7, 0.0 }
 0x201   : > { %627 = vadd.xlane.f32.xlu0 %v626_v8 }
 0x28e   : > { %v628_v9 = vpop.xlane.xlu0 %627 }
 0x28f   : > { %v629_v10 = vmul.f32 0.03125, %v628_v9 }
 0x291   : > { %v630_v12 = vadd.f32 1e-12, %v629_v10 }
 0x293   : > { %2614 = vrsqrt.f32 %v630_v12 }
 0x29d   : > { %v2615_v18 = vpop.eup %2614 }
 0x29e   : > { %v632_v19 = vmul.f32 %v2615_v18, %v624_v6 }
 0x2a0   : > { %v637_v21 = vmul.f32 %v636_v17, %v632_v19 }
 0x2a2   : > { %v642_v22 = vadd.f32 %v641_v20, %v637_v21 }
 0x2a4   : > { %643 = vst.msk [vmem:[#allocation2] sm:$0xff] %vm618_vm0, %v642_v22 }
 0x2a5 PF: > { %v2616_v23 = vld [vmem:[%s3597_s23] sm:$0xff]   ;;  %v3071_v24 = vmov 0.0   ;;  %v2617_v25 = vld [vmem:[%s3597_s23 + $0x8] sm:$0xff]   ;;  %vm3072_vm1 = vmmov 0   ;;  %vm668_vm2 = vcmask 261120   ;;  %v2618_v27 = vld [vmem:[%s3597_s23 + $0x10] sm:$0xff]   ;;  %v652_v30 = vlaneseq }
 0x2a6   : > { %2360 = vmatprep.subr.bf16.mxu1 %v3071_v24  ;;  %2376 = vmatprep.subr.bf16.mxu0 %v3071_v24  ;;  %v2619_v29 = vld [vmem:[%s3597_s23 + $0x18] sm:$0xff]   ;;  %v3655_v33 = vld [vmem:[%s546_s14] sm:$0xff]  ;;  %vm1058_vm3 = vcmask 64512   ;;  %vm1933_vm4 = vcmask 523264   ;;  %s3939_s29 = sld [smem:[#allocation27_spill]] }
 0x2a7   : > { %2361 = vmatpush3.bf16.msra.mxu1 %v2616_v23  ;;  %2364 = vmatprep.mubr.msk.bf16.mxu1 %vm3072_vm1, %v3071_v24  ;;  %v3650_v31 = vshrl.u32 %v652_v30, 7  ;;  %v2620_v47 = vld [vmem:[%s3597_s23 + $0x20] sm:$0xff]   ;;  %v2621_v48 = vld [vmem:[%s3597_s23 + $0x28] sm:$0xff]  }
 0x2a8   : > { %2362 = vmatprep.subr.bf16.mxu1 %v3071_v24  ;;  %2380 = vmatprep.mubr.msk.bf16.mxu0 %vm3072_vm1, %v3071_v24 }
 0x2a9   : > { %v654_v32 = vsub.s32 0, %v3650_v31  ;;  %v719_v40 = vsub.s32 1, %v3650_v31  ;;  %2377 = vmatpush3.bf16.msra.mxu0 %v2620_v47 }
 0x2aa   : > { %2378 = vmatprep.subr.bf16.mxu0 %v3071_v24 }
 0x2ab   : > { %v3632_v26 = vld [vmem:[#allocation2] sm:$0xff]  ;;  %2363 = vmatpush3.bf16.msra.mxu1 %v2617_v25  ;;  %v655_v34 = vrot.slane %v3655_v33, %v654_v32  ;;  %v720_v41 = vrot.slane %v3655_v33, %v719_v40 }
 0x2ac   : > { %v647_v28 = vpack.c.bf16 %v3632_v26, %v3632_v26  ;;  %2368 = vmatprep.subr.bf16.mxu1 %v3071_v24  ;;  %p2316_p0 = scmp.ne.s32.totalorder %s3939_s29, 1 }
 0x2ad   : > { %2379 = vmatpush3.bf16.msra.mxu0 %v2621_v48  ;;  %vm2006_vm5 = vcmask (!%p2316_p0), 253952  }
 0x2ae   : > { %2365 = vmatmul.mubr.msk.bf16.vlgmr.msra.gmra.mrb[0].mxu1 %vm668_vm2, %v647_v28  ;;  %2394 = vmatprep.subr.mxu0 %v3071_v24 }
 0x2af   : > { %2369 = vmatpush3.bf16.msra.mxu1 %v2618_v27  ;;  %2372 = vmatprep.mubr.msk.bf16.mxu1 %vm3072_vm1, %v3071_v24 }
 0x2b0   : > { %2370 = vmatprep.subr.bf16.mxu1 %v3071_v24  ;;  %2381 = vmatmul.mubr.msk.bf16.vlgmr.msra.gmra.mrb[0].mxu0 %vm668_vm2, %v647_v28 }
 0x2b1   : > { %2396 = vmatprep.mubr.msk.f32.mxu0 %vm3072_vm1, %v3071_v24 }
 0x2b3   : > { %2371 = vmatpush3.bf16.msra.mxu1 %v2619_v29 }
 0x2b4   : > { %2384 = vmatprep.subr.mxu1 %v3071_v24 }
 0x2b6   : > { %2373 = vmatmul.mubr.msk.bf16.vlgmr.msra.gmra.mrb[4].mxu1 %vm668_vm2, %v647_v28 }
 0x2b7   : > { %2386 = vmatprep.mubr.msk.f32.mxu1 %vm3072_vm1, %v3071_v24 }
 0x381   : > { %v706_v35 = vpop.f32.mrb[0].mxu1 }
 0x382   : > { %v2366_v36 = vpop.f32.mrb[1].mxu1  ;;  %v707_v37 = vadd.f32 %v706_v35, %v655_v34 }
 0x383   : > { %v709_v38 = vpop.f32.mrb[2].mxu1  ;;  %v3669_v56 = vpop.f32.mrb[0].mxu0 }
 0x384   : > { %898 = vxpose.xlu0.b32.start.end [1/1] (short) (narrow) %v707_v37, 32  ;;  %v2367_v39 = vpop.f32.mrb[3].mxu1  ;;  %v2382_v57 = vpop.f32.mrb[1].mxu0  ;;  %v780_v37 = vsub.s32 2, %v3650_v31 }
 0x385   : > { %v831_v58 = vpop.f32.mrb[2].mxu0  ;;  %v2623_v57 = vld [vmem:[%s511_s18 + $0x8] sm:$0xff]  }
 0x386   : > { %v2383_v59 = vpop.f32.mrb[3].mxu0  ;;  %v781_v38 = vrot.slane %v3655_v33, %v780_v37  ;;  %v2628_v37 = vld [vmem:[%s3614_s2 + $0x10] sm:$0xff]  }
 0x388   : > { %v829_v39 = vadd.f32 %v3669_v56, %v781_v38  ;;  %v2622_v56 = vld [vmem:[%s511_s18] sm:$0xff]  }
 0x389   : > { %v767_v42 = vpop.f32.mrb[4].mxu1  ;;  %v2629_v38 = vld [vmem:[%s3614_s2 + $0x18] sm:$0xff]  }
 0x38a   : > { %v2374_v43 = vpop.f32.mrb[5].mxu1  ;;  %v768_v46 = vadd.f32 %v767_v42, %v720_v41 }
 0x38b   : > { %v770_v44 = vpop.f32.mrb[6].mxu1 }
 0x38c   : > { %v2375_v45 = vpop.f32.mrb[7].mxu1 }
 0x391   : > { %834 = vxpose.xlu0.b32.start.end [1/1] (short) (narrow) %v768_v46, 32 }
 0x404   : > { %v914_v49 = vpop.trf.xlu0 }
 0x405   : > { %930 = vxpose.xlu1.b32.start.end [1/1] (short) (narrow) %v914_v49, 8 }
 0x408   : > { %v915_v50 = vpop.trf.xlu0 }
 0x409   : > { %962 = vxpose.xlu1.b32.start.end [1/1] (short) (narrow) %v915_v50, 8 }
 0x40c   : > { %v916_v51 = vpop.trf.xlu0 }
 0x40d   : > { %994 = vxpose.xlu1.b32.start.end [1/1] (short) (narrow) %v916_v51, 8 }
 0x410   : > { %v917_v52 = vpop.trf.xlu0 }
 0x411   : > { %1026 = vxpose.xlu1.b32.start.end [1/1] (short) (narrow) %v917_v52, 8 }
 0x414   : > { %v850_v53 = vpop.trf.xlu0 }
 0x415   : > { %2385 = vmatpush3.msra.mxu1 %v850_v53 }
 0x416   : > { %2389 = vmatprep.subr.mxu1 %v3071_v24 }
 0x418   : > { %v851_v54 = vpop.trf.xlu0 }
 0x41c   : > { %v852_v55 = vpop.trf.xlu0 }
 0x41d   : > { %2395 = vmatpush3.msra.mxu0 %v852_v55 }
 0x41e   : > { %2404 = vmatprep.subr.mxu0 %v3071_v24 }
 0x420   : > { %v853_v61 = vpop.trf.xlu0 }
 0x485   : > { %v946_v60 = vpop.trf.xlu1 }
 0x486   : > { %2387 = vmatmul.mubr.msk.f32.vlgmr.msra.gmra.mrb[8].mxu1 %vm1058_vm3, %v946_v60 }
 0x487   : > { %2390 = vmatpush3.msra.mxu1 %v851_v54  ;;  %2391 = vmatprep.mubr.msk.f32.mxu1 %vm3072_vm1, %v3071_v24 }
 0x488   : > { %2399 = vmatprep.subr.mxu1 %v3071_v24 }
 0x489   : > { %v978_v62 = vpop.trf.xlu1 }
 0x48a   : > { %2392 = vmatmul.mubr.msk.f32.vlgmr.msra.gmra.mrb[10].mxu1 %vm1058_vm3, %v978_v62 }
 0x48b   : > { %2400 = vmatpush3.msra.mxu1 %v853_v61  ;;  %2401 = vmatprep.mubr.msk.f32.mxu1 %vm3072_vm1, %v3071_v24 }
 0x48c   : > { %2409 = vmatprep.subr.mxu1 %v3071_v24 }
 0x48d   : > { %v1010_v63 = vpop.trf.xlu1 }
 0x48e   : > { %2397 = vmatmul.mubr.msk.f32.vlgmr.msra.gmra.mrb[4].mxu0 %vm1058_vm3, %v1010_v63 }
 0x48f   : > { %2406 = vmatprep.mubr.msk.f32.mxu0 %vm3072_vm1, %v3071_v24 }
 0x491   : > { %v1042_v0 = vpop.trf.xlu1 }
 0x492   : > { %2402 = vmatmul.mubr.msk.f32.vlgmr.msra.gmra.mrb[12].mxu1 %vm1058_vm3, %v1042_v0 }
 0x493   : > { %2411 = vmatprep.mubr.msk.f32.mxu1 %vm3072_vm1, %v3071_v24 }
 0x559   : > { %v1128_v1 = vpop.f32.mrb[8].mxu1 }
 0x55a   : > { %v2388_v2 = vpop.f32.mrb[9].mxu1  ;;  %v1351_v3 = vsel %vm1058_vm3, %v1128_v1, -inf }
 0x55b   : > { %1352 = vmax.xlane.f32.xlu1 %v1351_v3 }
 0x55d   : > { %v1201_v4 = vpop.f32.mrb[10].mxu1 }
 0x55e   : > { %v2393_v5 = vpop.f32.mrb[11].mxu1  ;;  %v1354_v6 = vsel %vm1058_vm3, %v1201_v4, -inf }
 0x55f   : > { %1355 = vmax.xlane.f32.xlu0 %v1354_v6 }
 0x561   : > { %v1274_v7 = vpop.f32.mrb[4].mxu0 }
 0x562   : > { %v2398_v8 = vpop.f32.mrb[5].mxu0  ;;  %v1357_v9 = vsel %vm1058_vm3, %v1274_v7, -inf }
 0x563   : > { %1358 = vmax.xlane.f32.xlu1 %v1357_v9 }
 0x565   : > { %v1347_v10 = vpop.f32.mrb[12].mxu1 }
 0x566   : > { %v1360_v11 = vsel %vm1058_vm3, %v1347_v10, -inf  ;;  %v2403_v12 = vpop.f32.mrb[13].mxu1 }
 0x567   : > { %1361 = vmax.xlane.f32.xlu1 %v1360_v11 }
 0x5e8   : > { %v1353_v13 = vpop.xlane.xlu1 %1352 }
 0x5e9   : > { %v1363_v14 = vsub.f32 %v1128_v1, %v1353_v13 }
 0x5eb   : > { %v1367_v15 = vmul.f32 1.442695, %v1363_v14 }
 0x5ec   : > { %v1356_v16 = vpop.xlane.xlu0 %1355 }
 0x5ed   : > { %2630 = vpow2.f32 %v1367_v15  ;;  %v1364_v17 = vsub.f32 %v1201_v4, %v1356_v16  ;;  %v1738_v4 = vsub.s32 3, %v3650_v31 }
 0x5ef   : > { %v1369_v18 = vmul.f32 1.442695, %v1364_v17  ;;  %v1739_v5 = vrot.slane %v3655_v33, %v1738_v4 }
 0x5f0   : > { %v1359_v19 = vpop.xlane.xlu1 %1358 }
 0x5f1   : > { %2632 = vpow2.f32 %v1369_v18  ;;  %v1365_v20 = vsub.f32 %v1274_v7, %v1359_v19  ;;  %v2624_v18 = vld [vmem:[%s520_s25] sm:$0xff]   ;;  %v2625_v19 = vld [vmem:[%s520_s25 + $0x8] sm:$0xff]  }
 0x5f3   : > { %v1371_v21 = vmul.f32 1.442695, %v1365_v20 }
 0x5f4   : > { %v1362_v22 = vpop.xlane.xlu1 %1361 }
 0x5f5   : > { %2634 = vpow2.f32 %v1371_v21  ;;  %v1366_v23 = vsub.f32 %v1347_v10, %v1362_v22  ;;  %v1812_v22 = vsub.s32 4, %v3650_v31 }
 0x5f7   : > { %v2631_v25 = vpop.eup %2630  ;;  %v1373_v27 = vmul.f32 1.442695, %v1366_v23  ;;  %v1817_v23 = vsub.s32 5, %v3650_v31 }
 0x5f8   : > { %v1375_v28 = vsel %vm1058_vm3, %v2631_v25, 0.0 }
 0x5f9   : > { %2636 = vpow2.f32 %v1373_v27  ;;  %1376 = vadd.xlane.f32.xlu1 %v1375_v28 }
 0x5fb   : > { %v2633_v29 = vpop.eup %2632 }
 0x5fc   : > { %v1378_v30 = vsel %vm1058_vm3, %v2633_v29, 0.0 }
 0x5fd   : > { %1379 = vadd.xlane.f32.xlu1 %v1378_v30 }
 0x5ff   : > { %v2635_v32 = vpop.eup %2634 }
 0x600   : > { %v1381_v34 = vsel %vm1058_vm3, %v2635_v32, 0.0 }
 0x601   : > { %1382 = vadd.xlane.f32.xlu1 %v1381_v34 }
 0x603   : > { %v2637_v35 = vpop.eup %2636 }
 0x604   : > { %v1384_v36 = vsel %vm1058_vm3, %v2637_v35, 0.0 }
 0x605   : > { %1385 = vadd.xlane.f32.xlu0 %v1384_v36  ;;  %v2627_v36 = vld [vmem:[%s3614_s2 + $0x8] sm:$0xff]  }
 0x634   : > { %866 = vxpose.xlu1.b32.start.end [1/1] (short) (narrow) %v829_v39, 32  ;;  %v2306_v39 = vld [vmem:[%s528_s1] ss:$0 sm:$0xff] }
 0x686   : > { %v1377_v40 = vpop.xlane.xlu1 %1376 }
 0x687   : > { %2638 = vrcp.f32 %v1377_v40 }
 0x68a   : > { %v1380_v41 = vpop.xlane.xlu1 %1379 }
 0x68b   : > { %2640 = vrcp.f32 %v1380_v41 }
 0x68e   : > { %v1383_v46 = vpop.xlane.xlu1 %1382 }
 0x68f   : > { %2642 = vrcp.f32 %v1383_v46 }
 0x691   : > { %v2639_v42 = vpop.eup %2638 }
 0x692   : > { %v1388_v43 = vmul.f32 %v2639_v42, %v2631_v25  ;;  %v1386_v47 = vpop.xlane.xlu0 %1385  ;;  %v1813_v25 = vrot.slane %v3655_v33, %v1812_v22 }
 0x693   : > { %2644 = vrcp.f32 %v1386_v47 }
 0x694   : > { %2405 = vmatpush3.xpose.msk.msra.mxu0 %vm1058_vm3, %v1388_v43 }
 0x695   : > { %v2641_v44 = vpop.eup %2640  ;;  %2414 = vmatprep.subr.mxu0 %v3071_v24 }
 0x696   : > { %v1390_v45 = vmul.f32 %v2641_v44, %v2633_v29  ;;  %v1818_v29 = vrot.slane %v3655_v33, %v1817_v23 }
 0x698   : > { %2410 = vmatpush3.xpose.msk.msra.mxu1 %vm1058_vm3, %v1390_v45 }
 0x699   : > { %2419 = vmatprep.subr.mxu1 %v3071_v24  ;;  %v2643_v48 = vpop.eup %2642 }
 0x69a   : > { %v1392_v49 = vmul.f32 %v2643_v48, %v2635_v32 }
 0x69d   : > { %v2645_v51 = vpop.eup %2644 }
 0x69e   : > { %v1394_v52 = vmul.f32 %v2645_v51, %v2637_v35  ;;  %v2626_v35 = vld [vmem:[%s3614_s2] sm:$0xff]  }
 0x6b4   : > { %v882_v50 = vpop.trf.xlu1 }
 0x6b5   : > { %2407 = vmatmul.mubr.msk.f32.vlgmr.msra.gmra.mrb[6].mxu0 %vm1058_vm3, %v882_v50 }
 0x6b6   : > { %2415 = vmatpush3.xpose.msk.msra.mxu0 %vm1058_vm3, %v1392_v49  ;;  %2416 = vmatprep.mubr.msk.f32.mxu0 %vm3072_vm1, %v3071_v24 }
 0x6b7   : > { %2424 = vmatprep.subr.bf16.mxu0 %v3071_v24 }
 0x6b8   : > { %v883_v53 = vpop.trf.xlu1 }
 0x6b9   : > { %2412 = vmatmul.mubr.msk.f32.vlgmr.msra.gmra.mrb[14].mxu1 %vm1058_vm3, %v883_v53 }
 0x6ba   : > { %2420 = vmatpush3.xpose.msk.msra.mxu1 %vm1058_vm3, %v1394_v52  ;;  %2421 = vmatprep.mubr.msk.f32.mxu1 %vm3072_vm1, %v3071_v24 }
 0x6bb   : > { %2432 = vmatprep.subr.bf16.mxu1 %v3071_v24 }
 0x6bc   : > { %v884_v54 = vpop.trf.xlu1 }
 0x6bd   : > { %2417 = vmatmul.mubr.msk.f32.vlgmr.msra.gmra.mrb[8].mxu0 %vm1058_vm3, %v884_v54  ;;  %v1907_v54 = vsub.s32 6, %v3650_v31 }
 0x6be   : > { %2428 = vmatprep.mubr.msk.bf16.mxu0 %vm3072_vm1, %v3071_v24  ;;  %2425 = vmatpush3.bf16.msra.mxu0 %v2622_v56 }
 0x6bf   : > { %2426 = vmatprep.subr.bf16.mxu0 %v3071_v24 }
 0x6c0   : > { %v885_v55 = vpop.trf.xlu1 }
 0x6c1   : > { %2422 = vmatmul.mubr.msk.f32.vlgmr.msra.gmra.mrb[16].mxu1 %vm1058_vm3, %v885_v55  ;;  %v1908_v55 = vrot.slane %v3655_v33, %v1907_v54 }
 0x6c2   : > { %2436 = vmatprep.mubr.msk.bf16.mxu1 %vm3072_vm1, %v3071_v24  ;;  %2427 = vmatpush3.bf16.msra.mxu0 %v2623_v57 }
 0x6c3   : > { %2440 = vmatprep.subr.bf16.mxu0 %v3071_v24  ;;  %2433 = vmatpush3.bf16.msra.mxu1 %v2624_v18 }
 0x6c4   : > { %2434 = vmatprep.subr.bf16.mxu1 %v3071_v24 }
 0x6c7   : > { %2435 = vmatpush3.bf16.msra.mxu1 %v2625_v19 }
 0x788   : > { %v1467_v58 = vpop.f32.mrb[6].mxu0 }
 0x789   : > { %1699 = vxpose.xlu0.b32.start [1/4] (short) (narrow) %v1467_v58, 8  ;;  %v2408_v59 = vpop.f32.mrb[7].mxu0 }
 0x78c   : > { %v1543_v60 = vpop.f32.mrb[14].mxu1 }
 0x78d   : > { %1700 = vxpose.xlu0.b32.cont [2/4] (short) (narrow) %v1543_v60, 8  ;;  %v2413_v61 = vpop.f32.mrb[15].mxu1 }
 0x790   : > { %v1619_v62 = vpop.f32.mrb[8].mxu0 }
 0x791   : > { %v2418_v63 = vpop.f32.mrb[9].mxu0  ;;  %1701 = vxpose.xlu0.b32.cont [3/4] (short) (narrow) %v1619_v62, 8 }
 0x794   : > { %v1695_v0 = vpop.f32.mrb[16].mxu1 }
 0x795   : > { %1702 = vxpose.xlu0.b32.end [4/4] (short) (narrow) %v1695_v0, 8  ;;  %v2423_v1 = vpop.f32.mrb[17].mxu1 }
 0x809   : > { %v1715_v2 = vpop.trf.xlu0 }
 0x80a   : > { %v1731_v3 = vpack.c.bf16 %v1715_v2, %v1715_v2 }
 0x80c   : > { %2429 = vmatmul.mubr.msk.bf16.vlgmr.msra.gmra.mrb[12].mxu0 %vm668_vm2, %v1731_v3 }
 0x80d   : > { %2448 = vmatprep.mubr.msk.bf16.mxu0 %vm3072_vm1, %v3071_v24  ;;  %2441 = vmatpush3.bf16.msra.mxu0 %v2626_v35 }
 0x80e   : > { %2442 = vmatprep.subr.bf16.mxu0 %v3071_v24 }
 0x811   : > { %2443 = vmatpush3.bf16.msra.mxu0 %v2627_v36 }
 0x812   : > { %2444 = vmatprep.subr.bf16.mxu0 %v3071_v24 }
 0x815   : > { %2445 = vmatpush3.bf16.msra.mxu0 %v2628_v37 }
 0x816   : > { %2446 = vmatprep.subr.bf16.mxu0 %v3071_v24 }
 0x819   : > { %2447 = vmatpush3.bf16.msra.mxu0 %v2629_v38 }
 0x8df   : > { %v1789_v6 = vpop.f32.mrb[12].mxu0 }
 0x8e0   : > { %v1790_v7 = vadd.f32 %v1789_v6, %v1739_v5  ;;  %v2430_v8 = vpop.f32.mrb[13].mxu0 }
 0x8e1   : > { %v1792_v9 = vpop.f32.mrb[14].mxu0 }
 0x8e2   : > { %v2431_v10 = vpop.f32.mrb[15].mxu0  ;;  %v1795_v11 = vadd.f32 %v1790_v7, %v3632_v26  ;;  %v1993_v7 = vsub.s32 7, %v3650_v31 }
 0x8e4   : > { %v1796_v12 = vsel %vm668_vm2, %v1795_v11, 0.0  ;;  %v1994_v8 = vrot.slane %v3655_v33, %v1993_v7 }
 0x8e5   : > { %1797 = vadd.xlane.f32.xlu1 %v1796_v12 }
 0x972   : > { %v1798_v13 = vpop.xlane.xlu1 %1797 }
 0x973   : > { %v1800_v14 = vmul.f32 0.03125, %v1798_v13 }
 0x975   : > { %v1801_v15 = vsub.f32 %v1795_v11, %v1800_v14  ;;  %v2315_v11 = vld [vmem:[%s546_s14 + $0x8] ss:$0 sm:$0xff] }
 0x977   : > { %v1802_v16 = vmul.f32 %v1801_v15, %v1801_v15 }
 0x979   : > { %v1803_v17 = vsel %vm668_vm2, %v1802_v16, 0.0 }
 0x97a   : > { %1804 = vadd.xlane.f32.xlu0 %v1803_v17 }
 0xa07   : > { %v1805_v26 = vpop.xlane.xlu0 %1804 }
 0xa08   : > { %v1806_v20 = vmul.f32 0.03125, %v1805_v26 }
 0xa0a   : > { %v1807_v21 = vadd.f32 1e-12, %v1806_v20 }
 0xa0c   : > { %2646 = vrsqrt.f32 %v1807_v21 }
 0xa16   : > { %v2647_v27 = vpop.eup %2646 }
 0xa17   : > { %v1809_v28 = vmul.f32 %v2647_v27, %v1801_v15 }
 0xa19   : > { %v1814_v30 = vmul.f32 %v1813_v25, %v1809_v28 }
 0xa1b   : > { %v1819_v32 = vadd.f32 %v1818_v29, %v1814_v30 }
 0xa1d   : > { %v1820_v34 = vpack.c.bf16 %v1819_v32, %v1819_v32 }
 0xa1f   : > { %2437 = vmatmul.mubr.msk.bf16.vlgmr.msra.gmra.mrb[20].mxu1 %vm668_vm2, %v1820_v34 }
 0xaf2   : > { %v1881_v40 = vpop.f32.mrb[20].mxu1 }
 0xaf3   : > { %v1882_v41 = vadd.f32 %v2306_v39, %v1881_v40  ;;  %v2438_v42 = vpop.f32.mrb[21].mxu1 }
 0xaf4   : > { %v1884_v43 = vpop.f32.mrb[22].mxu1 }
 0xaf5   : > { %v1888_v44 = vmul.f32 0.044715, %v1882_v41  ;;  %v2439_v45 = vpop.f32.mrb[23].mxu1  ;;  %v1887_v51 = vmul.f32 0.5, %v1882_v41 }
 0xaf7   : > { %v1889_v46 = vmul.f32 %v1888_v44, %v1882_v41 }
 0xaf9   : > { %v1890_v47 = vmul.f32 %v1889_v46, %v1882_v41 }
 0xafb   : > { %v1891_v48 = vadd.f32 %v1890_v47, %v1882_v41 }
 0xafd   : > { %v1892_v49 = vmul.f32 0.7978846, %v1891_v48 }
 0xaff   : > { %2648 = vtanh.f32 %v1892_v49 }
 0xb09   : > { %v2649_v50 = vpop.eup %2648 }
 0xb0a   : > { %v1894_v52 = vadd.f32 1.0, %v2649_v50 }
 0xb0c   : > { %v1895_v53 = vmul.f32 %v1894_v52, %v1887_v51 }
 0xb0e   : > { %v1896_v24 = vpack.c.bf16 %v1895_v53, %v1895_v53 }
 0xb10   : > { %2449 = vmatmul.mubr.msk.bf16.vlgmr.msra.gmra.mrb[16].mxu0 %vm1933_vm4, %v1896_v24 }
 0xbe3   : > { %v1971_v56 = vpop.f32.mrb[16].mxu0 }
 0xbe4   : > { %v1972_v57 = vadd.f32 %v1971_v56, %v1908_v55  ;;  %v2450_v58 = vpop.f32.mrb[17].mxu0 }
 0xbe5   : > { %v1974_v59 = vpop.f32.mrb[18].mxu0 }
 0xbe6   : > { %v2451_v60 = vpop.f32.mrb[19].mxu0  ;;  %v1977_v61 = vadd.f32 %v1972_v57, %v1819_v32 }
 0xbe8   : > { %v1978_v62 = vsel %vm668_vm2, %v1977_v61, 0.0 }
 0xbe9   : > { %1979 = vadd.xlane.f32.xlu1 %v1978_v62 }
 0xc76   : > { %v1980_v63 = vpop.xlane.xlu1 %1979 }
 0xc77   : > { %v1981_v0 = vmul.f32 0.03125, %v1980_v63 }
 0xc79   : > { %v1982_v1 = vsub.f32 %v1977_v61, %v1981_v0 }
 0xc7b   : > { %v1983_v2 = vmul.f32 %v1982_v1, %v1982_v1 }
 0xc7d   : > { %v1984_v3 = vsel %vm668_vm2, %v1983_v2, 0.0 }
 0xc7e   : > { %1985 = vadd.xlane.f32.xlu0 %v1984_v3 }
 0xd0b   : > { %v1986_v4 = vpop.xlane.xlu0 %1985 }
 0xd0c   : > { %v1987_v5 = vmul.f32 0.03125, %v1986_v4 }
 0xd0e   : > { %v1988_v6 = vadd.f32 1e-12, %v1987_v5 }
 0xd10   : > { %2650 = vrsqrt.f32 %v1988_v6 }
 0xd1a   : > { %v2651_v9 = vpop.eup %2650 }
 0xd1b   : > { %v1990_v10 = vmul.f32 %v2651_v9, %v1982_v1  ;;  %2005 = sbr.rel (%p2316_p0) target bundleno = 3363 (0xd23), region = 100 }
 0xd1d   : > { %v1995_v12 = vmul.f32 %v1994_v8, %v1990_v10 }
 0xd1f   : > { %v2000_v13 = vadd.f32 %v2315_v11, %v1995_v12 }
 0xd21   : > { %2001 = vst.msk [vmem:[#allocation2] sm:$0xff] %vm668_vm2, %v2000_v13 }
 0xd22   : > { %2007 = vst.msk [vmem:[%s608_s8] sm:$0x1] %vm2006_vm5, %v2000_v13 }
 0xd23 PF: > { %s3940_s3 = sld [smem:[#allocation28_spill]]  ;;  %s2021_s22 = sshll.u32 %s608_s8, 4  ;;  %s2022_s22 = int_to_ptr.vmem [resolvable:$true] %s2021_s22 }
 0xd24   : > { %s3941_s27 = sld [smem:[#allocation45_spill]]  ;;  %s2009_s23 = scalar_lea.sflag [#allocation5], %s3580_s0 }
 0xd25   : > { %s2918_s9 = scalar_lea.vmem %s2022_s22, 16  ;;  %p3942_p1 = scmp.ne.s32.totalorder %s3908_s30, 0 }
 0xd26   : > { %p2919_p4 = scmp.ne.s32.totalorder %s2022_s22, %s2918_s9  ;;  %s3073_s18 = smov [#allocation18]  }
 0xd27   : > { %s2922_s20 = sshll.u32 %s3073_s18, 4  ;;  %s2923_s20 = int_to_ptr.vmem [resolvable:$false] %s2922_s20 }
 0xd28   : > { %p2920_p2 = pnand %p2919_p4, %p3942_p1  ;;  %s2924_s25 = scalar_lea.vmem %s2923_s20, 32 }
 0xd29   : > { %s2317_s26 = sshll.u32 %s3940_s3, 4  ;;  %p2925_p13 = scmp.lt.s32.totalorder %s2022_s22, %s2923_s20 }
 0xd2a   : > { %s3765_s21 = scalar_lea.hbm %s3941_s27, %s2317_s26  ;;  %p2921_p3 = pneg %p2920_p2 }
 0xd2b   : > { %p2926_p5 = scmp.lt.s32.totalorder %s2924_s25, %s2918_s9 }
 0xd2d   : > { %p2927_p9 = por %p2926_p5, %p2925_p13 }
 0xd2f   : > { %p2928_p8 = pnand %p2927_p9, %p2921_p3 }
 0xd31   : > { %2931 = shalt.err (!%p2928_p8)
}
 0xd32   : > { %s2932_s0 = scalar_lea.hbm %s3765_s21, 16  ;;  %s2936_s10 = scalar_lea.hbm %s3941_s27, 32 }
 0xd33   : > { %p2933_p10 = scmp.ne.s32.totalorder %s3765_s21, %s2932_s0  ;;  %p2937_p12 = scmp.lt.u32.totalorder %s3765_s21, %s3941_s27 }
 0xd34   : > { %p2938_p11 = scmp.lt.u32.totalorder %s2936_s10, %s2932_s0  ;;  %p2940_p4 = scmp.lt.u32.totalorder %s2932_s0, %s3765_s21 }
 0xd35   : > { %p2934_p6 = pnand %p2933_p10, %p3942_p1 }
 0xd36   : > { %p2939_p0 = por %p2938_p11, %p2937_p12 }
 0xd37   : > { %p2935_p7 = pneg %p2934_p6 }
 0xd38   : > { %p2941_p2 = por %p2940_p4, %p2939_p0 }
 0xd3a   : > { %p2942_p3 = pnand %p2941_p2, %p2935_p7 }
 0xd3c   : > { %2945 = shalt.err (!%p2942_p3)
}
 0xd3d   : > { %2477 = dma.vmem_to_hbm [thread:$0]  (%p3942_p1), %s2022_s22, 16, %s3765_s21, %s2009_s23  }
 0xd3e PF: > { %p2517_p13 = scmp.ge.s32.totalorder %s3056_s19, 2  ;;  %s2033_s8 = sand.u32 1, %s3028_s12  }
 0xd3f   : > { %p3943_p5 = scmp.ne.s32.totalorder %s3911_s16, 0  ;;  %s2034_s24 = scalar_lea.sflag [#allocation5], %s2033_s8 }
 0xd41   : > { %p2509_p9 = pnand %p2517_p13, %p3943_p5 }
 0xd43   : > { %3011 = dma.done.wait (!%p2509_p9), %s2034_s24, 16  }
 0xd44   : > { %3013 = vsyncadd (!%p2509_p9), %s2034_s24, 4294967280  ;;  %s35_s19 = sadd.s32 1, %s3056_s19   ;;  %s3944_s30 = sld [smem:[#allocation25_spill]] }
 0xd45   : > { %p32_p8 = scmp.ge.s32.totalorder %s35_s19, 6   ;;  %s3945_s29 = sld [smem:[#allocation26_spill]] }
 0xd46   : > { %s3946_s14 = sld [smem:[#allocation35_spill]]  ;;  %s3947_s16 = sld [smem:[#allocation29_spill]] }
 0xd47   : > { %s3948_s3 = sld [smem:[#allocation33_spill]]  ;;  %s3949_s18 = sld [smem:[#allocation34_spill]] }
 0xd48   : > { %s3950_s10 = smov %s3024_s11  ;;  %s3951_s11 = smov %s3426_s4 }
 0xd49   : > { %s3952_s12 = smov %s3032_s13  ;;  %s3954_s15 = smov %s3048_s17 }
 0xd4a   :  { %34 = sbr.rel (!%p32_p8) target bundleno = 27 (0x1b), region = 191 }
 0xd4b   : > { %s3953_s13 = smov %s3945_s29 }
 0xd4d   : > { %s3955_s17 = smov %s3948_s3 }
 0xd51   :  { %2038 = vsyncpa [#allocation4], 1 }
 0xd52   :  { %2040 = vsyncpa [#allocation4 + $0x1], 1 }
 0xd53   :  { %2041 = vsyncpa [#allocation7], 1 }
 0xd54   :  { %2042 = vsyncpa [#allocation10], 1 }
 0xd55   :  { %2044 = vsyncpa [#allocation10 + $0x1], 1 }
 0xd56   :  { %2045 = vsyncpa [#allocation13], 1 }
 0xd57   :  { %2047 = vsyncpa [#allocation13 + $0x1], 1 }
 0xd58   :  { %2048 = vsyncpa [#allocation16], 1 }
 0xd59   :  { %2050 = vsyncpa [#allocation16 + $0x1], 1 }
 0xd5a   :  { %2051 = vsyncpa [#allocation5], 1 }
 0xd5b   :  { %2053 = vsyncpa [#allocation5 + $0x1], 1 }

</bundles_post_ra>
